<compile_context>
chip_gen: v7x
topology: tpu7x:2x2x1
jax: 0.10.0
libtpu: 0.0.40
codegen_flags: <defaults>
</compile_context>

<pallas_src>
import math

import jax
import jax.numpy as jnp
from jax.experimental import pallas as pl
from jax.experimental.pallas import tpu as pltpu

_LANE = 128


def _round_up(x, m):
    return ((x + m - 1) // m) * m


# ----------------------------- kernel bodies ------------------------------ #

def _attention_core(query, key, value, out_dtype):
    """Scaled dot-product attention. The 1/sqrt(H) scale is already folded into
    the Q projection; softmax math is f32; normalization happens after the PV
    matmul (O(S*H) instead of O(S^2) VPU work)."""
    # TODO(synk): flash-style online-softmax KV tiling for S >~ 1-2K (the full
    #             (BT,S,S) f32 scores block outgrows v7x VMEM in that regime).
    scores = jnp.einsum('bqh,bkh->bqk', query, key,
                        preferred_element_type=jnp.float32)        # (BT,S,S) f32
    scores = scores - jnp.max(scores, axis=-1, keepdims=True)
    # TODO(synk): mask path omitted -- reference's masked_fill is not in-place
    #             and mask defaults to None, so it never affects the output.
    # TODO(synk): large-S v6e/v7x variant could run exp in bf16; kept f32 here.
    p = jnp.exp(scores)
    denom = jnp.sum(p, axis=-1, keepdims=True)                     # (BT,S,1)
    inv = pl.reciprocal(denom, approx=True)                        # EUP slot
    inv = inv * (2.0 - denom * inv)                                # Newton -> ~f32
    ctx = jnp.einsum('bqk,bkh->bqh', p.astype(value.dtype), value,
                     preferred_element_type=jnp.float32)           # (BT,S,Hp) f32
    # TODO(synk): dropout is identity in eval mode; training dropout omitted.
    return (ctx * inv).astype(out_dtype)


def _fused_qkv_kernel(x_ref, w_ref, b_ref, o_ref):
    """3*H <= 128 path: q|k|v concatenated (zero-padded) on the lane axis; the
    three projections are one (rows,128)@(128,3*Hp) block-diagonal matmul."""
    bt, s, kdim = x_ref.shape
    h_pad = w_ref.shape[1] // 3
    rows = bt * s
    cdt = x_ref.dtype
    # (BT,S,K) -> (BT*S,K): leading-dim collapse (layout-free when S % 8 == 0).
    x2 = x_ref[...].reshape(rows, kdim)
    qkv = jnp.dot(x2, w_ref[...], preferred_element_type=jnp.float32) + b_ref[...]
    query = qkv[:, 0 * h_pad:1 * h_pad].astype(cdt).reshape(bt, s, h_pad)
    key   = qkv[:, 1 * h_pad:2 * h_pad].astype(cdt).reshape(bt, s, h_pad)
    value = qkv[:, 2 * h_pad:3 * h_pad].astype(cdt).reshape(bt, s, h_pad)
    o_ref[...] = _attention_core(query, key, value, o_ref.dtype)


def _split_qkv_kernel(q_ref, k_ref, v_ref, w_ref, b_ref, o_ref):
    """General path: separate (padded) q/k/v streams, stacked (3,Hp,Hp) weights."""
    bt, s, h_pad = q_ref.shape
    rows = bt * s
    cdt = q_ref.dtype
    q2 = q_ref[...].reshape(rows, h_pad)
    k2 = k_ref[...].reshape(rows, h_pad)
    v2 = v_ref[...].reshape(rows, h_pad)
    query = (jnp.dot(q2, w_ref[0], preferred_element_type=jnp.float32)
             + b_ref[0]).astype(cdt).reshape(bt, s, h_pad)
    key = (jnp.dot(k2, w_ref[1], preferred_element_type=jnp.float32)
           + b_ref[1]).astype(cdt).reshape(bt, s, h_pad)
    value = (jnp.dot(v2, w_ref[2], preferred_element_type=jnp.float32)
             + b_ref[2]).astype(cdt).reshape(bt, s, h_pad)
    o_ref[...] = _attention_core(query, key, value, o_ref.dtype)


# ------------------------------- wrapper ----------------------------------- #

def _num_tensorcores():
    """v5e/v6e: 1 TensorCore per chip; v7x: 2."""
    try:
        kind = jax.devices()[0].device_kind.lower()
    except Exception:
        return 1
    return 2 if "v7" in kind else 1


def _pick_bt(B, S, per_elem_bytes, fixed_bytes, *, target_rows=256, min_steps=1,
             vmem_budget=24 << 20):
    """Batch-tile size: fill the MXU M dim (BT*S ~ target_rows), keep at least
    `min_steps` grid steps, divide B, and stay inside the VMEM budget."""
    cap = max(1, B // min_steps)
    bt = max(1, min(B, cap, max(1, target_rows // S)))
    while bt > 1 and (B % bt != 0 or fixed_bytes + bt * per_elem_bytes > vmem_budget):
        bt -= 1
    return bt


def attention_head(q, k, v, wq, bq, wk, bk, wv, bv, *,
                   mxu_dtype=jnp.bfloat16, target_rows=256):
    """Forward of AttentionHead (eval mode):
       softmax((q Wq^T + bq)(k Wk^T + bk)^T / sqrt(H)) @ (v Wv^T + bv)."""
    B, S, H = q.shape
    out_dtype = q.dtype
    scale = 1.0 / math.sqrt(H)
    h_pad = _round_up(H, _LANE)
    fused = (3 * H) <= _LANE

    in_bytes = jnp.dtype(mxu_dtype).itemsize
    out_bytes = jnp.dtype(out_dtype).itemsize

    # Host-side one-time prep: transpose PyTorch [out,in] weights to [in,out],
    # fold the 1/sqrt(H) scale into the Q projection, zero-pad H to 128 lanes,
    # cast MXU operands (f32 accumulation stays in-kernel, biases stay f32).
    wq_s = (wq * scale).T.astype(jnp.float32)
    wk_t = wk.T.astype(jnp.float32)
    wv_t = wv.T.astype(jnp.float32)
    bq_s = (bq * scale).astype(jnp.float32)

    if fused:
        x = jnp.zeros((B, S, _LANE), mxu_dtype)
        x = x.at[..., 0:H].set(q.astype(mxu_dtype))
        x = x.at[..., H:2 * H].set(k.astype(mxu_dtype))
        x = x.at[..., 2 * H:3 * H].set(v.astype(mxu_dtype))
        w = jnp.zeros((_LANE, 3 * h_pad), jnp.float32)
        w = w.at[0:H, 0:H].set(wq_s)
        w = w.at[H:2 * H, h_pad:h_pad + H].set(wk_t)
        w = w.at[2 * H:3 * H, 2 * h_pad:2 * h_pad + H].set(wv_t)
        w = w.astype(mxu_dtype)
        b = jnp.zeros((1, 3 * h_pad), jnp.float32)
        b = b.at[0, 0:H].set(bq_s)
        b = b.at[0, h_pad:h_pad + H].set(bk.astype(jnp.float32))
        b = b.at[0, 2 * h_pad:2 * h_pad + H].set(bv.astype(jnp.float32))
        inputs = (x,)
        n_inputs, in_cols = 1, _LANE
        kernel = _fused_qkv_kernel
    else:
        def pad_x(a):
            return jnp.pad(a, ((0, 0), (0, 0), (0, h_pad - H))).astype(mxu_dtype)

        def pad_w(wt):
            return jnp.pad(wt, ((0, h_pad - H), (0, h_pad - H)))

        inputs = (pad_x(q), pad_x(k), pad_x(v))
        w = jnp.stack([pad_w(wq_s), pad_w(wk_t), pad_w(wv_t)]).astype(mxu_dtype)
        b = jnp.stack([jnp.pad(bq_s, (0, h_pad - H)),
                       jnp.pad(bk.astype(jnp.float32), (0, h_pad - H)),
                       jnp.pad(bv.astype(jnp.float32), (0, h_pad - H))]
                      ).reshape(3, 1, h_pad)
        n_inputs, in_cols = 3, h_pad
        kernel = _split_qkv_kernel

    # Tile sizing: fill the MXU M dim; single-TC chips get no forced split,
    # v7x gets >=3 steps per core so the pipeline can hide the input DMA.
    cores = _num_tensorcores()
    min_steps = 1 if cores == 1 else 3 * cores
    per_elem = S * (2 * n_inputs * in_cols * in_bytes      # double-buffered inputs
                    + 2 * h_pad * out_bytes                # double-buffered output
                    + 3 * h_pad * (4 + in_bytes)           # f32 proj accum + cast
                    + 2 * S * 4                            # scores + p (f32)
                    + h_pad * 4)                           # f32 context
    fixed = 2 * (w.size * in_bytes + b.size * 4)           # weight/bias buffers
    BT = _pick_bt(B, S, per_elem, fixed,
                  target_rows=target_rows, min_steps=min_steps)
    grid = (B // BT,)
    needed = fixed + BT * per_elem
    vmem_limit = int(min(max(2 * needed, 32 << 20), 48 << 20))

    def seq_spec(cols):
        return pl.BlockSpec((BT, S, cols), lambda i: (i, 0, 0))

    out_spec = pl.BlockSpec((BT, S, h_pad), lambda i: (i, 0, 0))
    out_shape = jax.ShapeDtypeStruct((B, S, h_pad), out_dtype)

    def run(weight_mode):
        kw = {} if weight_mode is None else {"pipeline_mode": weight_mode}
        w_spec = pl.BlockSpec(w.shape, lambda i: (0,) * w.ndim, **kw)
        b_spec = pl.BlockSpec(b.shape, lambda i: (0,) * b.ndim, **kw)
        return pl.pallas_call(
            kernel,
            out_shape=out_shape,
            grid_spec=pltpu.PrefetchScalarGridSpec(
                num_scalar_prefetch=0,
                grid=grid,
                in_specs=[seq_spec(in_cols)] * n_inputs + [w_spec, b_spec],
                out_specs=out_spec,
            ),
            compiler_params=pltpu.CompilerParams(
                dimension_semantics=("parallel",),
                vmem_limit_bytes=vmem_limit,
            ),
        )(*inputs, w, b)

    try:
        # Constant-index weight/bias streams: single buffer reclaims VMEM.
        out = run(pl.Buffered(1))
    except Exception:
        out = run(None)

    return out[:, :, :H]


# ------------------------------ reference ---------------------------------- #

def reference(q, k, v, wq, bq, wk, bk, wv, bv):
    query = q @ wq.T + bq
    key = k @ wk.T + bk
    value = v @ wv.T + bv
    scores = jnp.einsum('bsh,bth->bst', query, key) / math.sqrt(q.shape[-1])
    attn = jax.nn.softmax(scores, axis=-1)
    return jnp.einsum('bst,bth->bsh', attn, value)


if __name__ == "__main__":
    # Shapes consistent with the module (hidden=32, seq=8); B=16 exercises the
    # batch-tiling / megacore split on multi-core chips.
    B, S, H = 16, 8, 32
    key0 = jax.random.PRNGKey(0)
    ks = jax.random.split(key0, 9)

    q = jax.random.normal(ks[0], (B, S, H), dtype=jnp.float32)
    k = jax.random.normal(ks[1], (B, S, H), dtype=jnp.float32)
    v = jax.random.normal(ks[2], (B, S, H), dtype=jnp.float32)

    bound = 1.0 / math.sqrt(H)
    wq = jax.random.uniform(ks[3], (H, H), jnp.float32, -bound, bound)
    wk = jax.random.uniform(ks[4], (H, H), jnp.float32, -bound, bound)
    wv = jax.random.uniform(ks[5], (H, H), jnp.float32, -bound, bound)
    bq = jax.random.uniform(ks[6], (H,), jnp.float32, -bound, bound)
    bk = jax.random.uniform(ks[7], (H,), jnp.float32, -bound, bound)
    bv = jax.random.uniform(ks[8], (H,), jnp.float32, -bound, bound)

    ref = reference(q, k, v, wq, bq, wk, bk, wv, bv)

    # Default path: fused QKV projection (3H <= 128) with bf16 MXU operands.
    out = jax.block_until_ready(attention_head(q, k, v, wq, bq, wk, bk, wv, bv))
    assert out.shape == (B, S, H) and out.dtype == q.dtype
    assert jnp.allclose(out, ref, atol=3e-2, rtol=3e-2), "bf16-MXU path mismatch"

    # f32-MXU variant checks exact eval-mode semantics at tight tolerance.
    out32 = jax.block_until_ready(
        attention_head(q, k, v, wq, bq, wk, bk, wv, bv, mxu_dtype=jnp.float32))
    assert jnp.allclose(out32, ref, atol=1e-4, rtol=1e-4), "f32-MXU path mismatch"

    # Exercise the general (split, 3H > 128) path as well.
    H2, B2 = 64, 4
    ks2 = jax.random.split(jax.random.PRNGKey(1), 9)
    q2 = jax.random.normal(ks2[0], (B2, S, H2), jnp.float32)
    k2 = jax.random.normal(ks2[1], (B2, S, H2), jnp.float32)
    v2 = jax.random.normal(ks2[2], (B2, S, H2), jnp.float32)
    bound2 = 1.0 / math.sqrt(H2)
    wq2 = jax.random.uniform(ks2[3], (H2, H2), jnp.float32, -bound2, bound2)
    wk2 = jax.random.uniform(ks2[4], (H2, H2), jnp.float32, -bound2, bound2)
    wv2 = jax.random.uniform(ks2[5], (H2, H2), jnp.float32, -bound2, bound2)
    bq2 = jax.random.uniform(ks2[6], (H2,), jnp.float32, -bound2, bound2)
    bk2 = jax.random.uniform(ks2[7], (H2,), jnp.float32, -bound2, bound2)
    bv2 = jax.random.uniform(ks2[8], (H2,), jnp.float32, -bound2, bound2)
    out2 = jax.block_until_ready(
        attention_head(q2, k2, v2, wq2, bq2, wk2, bk2, wv2, bv2,
                       mxu_dtype=jnp.float32))
    ref2 = reference(q2, k2, v2, wq2, bq2, wk2, bk2, wv2, bv2)
    assert jnp.allclose(out2, ref2, atol=1e-4, rtol=1e-4), "split-path mismatch"

    print("KERNEL_OK")
</pallas_src>

<mosaic_0001>
module attributes {stable_mosaic.version = 11 : i64} {
  func.func @_fused_qkv_kernel(%arg0: i32, %arg1: memref<16x8x128xbf16, #tpu.memory_space<vmem>>, %arg2: memref<128x384xbf16, #tpu.memory_space<vmem>>, %arg3: memref<1x384xf32, #tpu.memory_space<vmem>>, %arg4: memref<16x8x128xf32, #tpu.memory_space<vmem>>) attributes {dimension_semantics = [#tpu.dimension_semantics<parallel>], iteration_bounds = array<i64: 1>, scalar_prefetch = 0 : i64, scratch_operands = 0 : i64, tpu.core_type = #tpu.core_type<tc>, window_params = [{transform_indices = @transform_0, window_bounds = array<i64: 16, 8, 128>}, {pipeline_mode = #tpu.pipeline_mode<synchronous>, transform_indices = @transform_1, window_bounds = array<i64: 128, 384>}, {pipeline_mode = #tpu.pipeline_mode<synchronous>, transform_indices = @transform_2, window_bounds = array<i64: 1, 384>}, {transform_indices = @transform_3, window_bounds = array<i64: 16, 8, 128>}]} {
    %c0 = arith.constant 0 : index
    %c0_0 = arith.constant 0 : index
    %c0_1 = arith.constant 0 : index
    %0 = vector.load %arg1[%c0, %c0_0, %c0_1] : memref<16x8x128xbf16, #tpu.memory_space<vmem>>, vector<16x8x128xbf16>
    %1 = vector.shape_cast %0 : vector<16x8x128xbf16> to vector<128x128xbf16>
    %c0_2 = arith.constant 0 : index
    %c0_3 = arith.constant 0 : index
    %2 = vector.load %arg2[%c0_2, %c0_3] : memref<128x384xbf16, #tpu.memory_space<vmem>>, vector<128x384xbf16>
    %cst = arith.constant dense<0.000000e+00> : vector<128x384xf32>
    %3 = tpu.matmul %1, %2, %cst {dimension_numbers = #tpu.dot_dimension_numbers<[1], [0], [0], [1], [0, 0, 1, 1], [], []>} : vector<128x128xbf16>, vector<128x384xbf16>, vector<128x384xf32> -> vector<128x384xf32>
    %c0_4 = arith.constant 0 : index
    %c0_5 = arith.constant 0 : index
    %4 = vector.load %arg3[%c0_4, %c0_5] : memref<1x384xf32, #tpu.memory_space<vmem>>, vector<1x384xf32>
    %5 = vector.broadcast %4 : vector<1x384xf32> to vector<128x384xf32>
    %6 = arith.addf %3, %5 : vector<128x384xf32>
    %7 = vector.extract_strided_slice %6 {offsets = [0, 0], sizes = [128, 128], strides = [1, 1]} : vector<128x384xf32> to vector<128x128xf32>
    %8 = arith.truncf %7 : vector<128x128xf32> to vector<128x128xbf16>
    %9 = vector.shape_cast %8 : vector<128x128xbf16> to vector<16x8x128xbf16>
    %10 = vector.extract_strided_slice %6 {offsets = [0, 128], sizes = [128, 128], strides = [1, 1]} : vector<128x384xf32> to vector<128x128xf32>
    %11 = arith.truncf %10 : vector<128x128xf32> to vector<128x128xbf16>
    %12 = vector.shape_cast %11 : vector<128x128xbf16> to vector<16x8x128xbf16>
    %13 = vector.extract_strided_slice %6 {offsets = [0, 256], sizes = [128, 128], strides = [1, 1]} : vector<128x384xf32> to vector<128x128xf32>
    %14 = arith.truncf %13 : vector<128x128xf32> to vector<128x128xbf16>
    %15 = vector.shape_cast %14 : vector<128x128xbf16> to vector<16x8x128xbf16>
    "tpu.trace_start"() <{level = 10 : i32, message = "bqh,bkh->bqk"}> : () -> ()
    %cst_6 = arith.constant dense<0.000000e+00> : vector<16x8x8xf32>
    %16 = tpu.matmul %9, %12, %cst_6 {dimension_numbers = #tpu.dot_dimension_numbers<[2], [2], [1], [1], [0, 0, 0, 1, 1, 1], [0], [0]>} : vector<16x8x128xbf16>, vector<16x8x128xbf16>, vector<16x8x8xf32> -> vector<16x8x8xf32>
    "tpu.trace_stop"() : () -> ()
    %cst_7 = arith.constant dense<0xFF800000> : vector<16x8xf32>
    %17 = vector.multi_reduction <maximumf>, %16, %cst_7 [2] : vector<16x8x8xf32> to vector<16x8xf32>
    %18 = vector.shape_cast %17 : vector<16x8xf32> to vector<16x8x1xf32>
    %19 = vector.broadcast %18 : vector<16x8x1xf32> to vector<16x8x8xf32>
    %20 = arith.subf %16, %19 : vector<16x8x8xf32>
    %21 = math.exp %20 : vector<16x8x8xf32>
    %cst_8 = arith.constant dense<0.000000e+00> : vector<16x8xf32>
    %22 = vector.multi_reduction <add>, %21, %cst_8 [2] : vector<16x8x8xf32> to vector<16x8xf32>
    %23 = vector.shape_cast %22 : vector<16x8xf32> to vector<16x8x1xf32>
    %24 = tpu.reciprocal %23 {approx = true} : vector<16x8x1xf32> -> vector<16x8x1xf32>
    %25 = arith.mulf %23, %24 : vector<16x8x1xf32>
    %cst_9 = arith.constant 2.000000e+00 : f32
    %26 = vector.broadcast %cst_9 : f32 to vector<16x8x1xf32>
    %27 = arith.subf %26, %25 : vector<16x8x1xf32>
    %28 = arith.mulf %24, %27 : vector<16x8x1xf32>
    %29 = arith.truncf %21 : vector<16x8x8xf32> to vector<16x8x8xbf16>
    "tpu.trace_start"() <{level = 10 : i32, message = "bqk,bkh->bqh"}> : () -> ()
    %cst_10 = arith.constant dense<0.000000e+00> : vector<16x8x128xf32>
    %30 = tpu.matmul %29, %15, %cst_10 {dimension_numbers = #tpu.dot_dimension_numbers<[2], [1], [1], [2], [0, 0, 0, 1, 1, 2], [0], [0]>} : vector<16x8x8xbf16>, vector<16x8x128xbf16>, vector<16x8x128xf32> -> vector<16x8x128xf32>
    "tpu.trace_stop"() : () -> ()
    %31 = vector.broadcast %28 : vector<16x8x1xf32> to vector<16x8x128xf32>
    %32 = arith.mulf %30, %31 : vector<16x8x128xf32>
    %c0_11 = arith.constant 0 : index
    %c0_12 = arith.constant 0 : index
    %c0_13 = arith.constant 0 : index
    %33 = vector.load %arg4[%c0_11, %c0_12, %c0_13] : memref<16x8x128xf32, #tpu.memory_space<vmem>>, vector<16x8x128xf32>
    tpu.vector_store %arg4[%c0_11, %c0_12, %c0_13], %32 {strides = array<i32>} : memref<16x8x128xf32, #tpu.memory_space<vmem>>, vector<16x8x128xf32>,
    return
  }
  func.func @transform_0(%arg0: i32) -> (i32, i32, i32) {
    %c0_i32 = arith.constant 0 : i32
    %c0_i32_0 = arith.constant 0 : i32
    %c0_i32_1 = arith.constant 0 : i32
    return %arg0, %c0_i32, %c0_i32_0 : i32, i32, i32
  }
  func.func @transform_1(%arg0: i32) -> (i32, i32) {
    %c0_i32 = arith.constant 0 : i32
    %c0_i32_0 = arith.constant 0 : i32
    %c0_i32_1 = arith.constant 0 : i32
    return %c0_i32, %c0_i32_0 : i32, i32
  }
  func.func @transform_2(%arg0: i32) -> (i32, i32) {
    %c0_i32 = arith.constant 0 : i32
    %c0_i32_0 = arith.constant 0 : i32
    %c0_i32_1 = arith.constant 0 : i32
    return %c0_i32, %c0_i32_0 : i32, i32
  }
  func.func @transform_3(%arg0: i32) -> (i32, i32, i32) {
    %c0_i32 = arith.constant 0 : i32
    %c0_i32_0 = arith.constant 0 : i32
    %c0_i32_1 = arith.constant 0 : i32
    return %arg0, %c0_i32, %c0_i32_0 : i32, i32, i32
  }
}

module attributes {stable_mosaic.version = 11 : i64} {
  func.func @_fused_qkv_kernel(%arg0: i32, %arg1: memref<16x8x128xbf16, #tpu.memory_space<vmem>>, %arg2: memref<128x384xbf16, #tpu.memory_space<vmem>>, %arg3: memref<1x384xf32, #tpu.memory_space<vmem>>, %arg4: memref<16x8x128xf32, #tpu.memory_space<vmem>>) attributes {dimension_semantics = [#tpu.dimension_semantics<parallel>], iteration_bounds = array<i64: 1>, scalar_prefetch = 0 : i64, scratch_operands = 0 : i64, tpu.core_type = #tpu.core_type<tc>, window_params = [{transform_indices = @transform_0, window_bounds = array<i64: 16, 8, 128>}, {pipeline_mode = #tpu.pipeline_mode<synchronous>, transform_indices = @transform_1, window_bounds = array<i64: 128, 384>}, {pipeline_mode = #tpu.pipeline_mode<synchronous>, transform_indices = @transform_2, window_bounds = array<i64: 1, 384>}, {transform_indices = @transform_3, window_bounds = array<i64: 16, 8, 128>}]} {
    %c0 = arith.constant 0 : index
    %c0_0 = arith.constant 0 : index
    %c0_1 = arith.constant 0 : index
    %0 = vector.load %arg1[%c0, %c0_0, %c0_1] : memref<16x8x128xbf16, #tpu.memory_space<vmem>>, vector<16x8x128xbf16>
    %1 = vector.shape_cast %0 : vector<16x8x128xbf16> to vector<128x128xbf16>
    %c0_2 = arith.constant 0 : index
    %c0_3 = arith.constant 0 : index
    %2 = vector.load %arg2[%c0_2, %c0_3] : memref<128x384xbf16, #tpu.memory_space<vmem>>, vector<128x384xbf16>
    %cst = arith.constant dense<0.000000e+00> : vector<128x384xf32>
    %3 = tpu.matmul %1, %2, %cst {dimension_numbers = #tpu.dot_dimension_numbers<[1], [0], [0], [1], [0, 0, 1, 1], [], []>} : vector<128x128xbf16>, vector<128x384xbf16>, vector<128x384xf32> -> vector<128x384xf32>
    %c0_4 = arith.constant 0 : index
    %c0_5 = arith.constant 0 : index
    %4 = vector.load %arg3[%c0_4, %c0_5] : memref<1x384xf32, #tpu.memory_space<vmem>>, vector<1x384xf32>
    %5 = vector.broadcast %4 : vector<1x384xf32> to vector<128x384xf32>
    %6 = arith.addf %3, %5 : vector<128x384xf32>
    %7 = vector.extract_strided_slice %6 {offsets = [0, 0], sizes = [128, 128], strides = [1, 1]} : vector<128x384xf32> to vector<128x128xf32>
    %8 = arith.truncf %7 : vector<128x128xf32> to vector<128x128xbf16>
    %9 = vector.shape_cast %8 : vector<128x128xbf16> to vector<16x8x128xbf16>
    %10 = vector.extract_strided_slice %6 {offsets = [0, 128], sizes = [128, 128], strides = [1, 1]} : vector<128x384xf32> to vector<128x128xf32>
    %11 = arith.truncf %10 : vector<128x128xf32> to vector<128x128xbf16>
    %12 = vector.shape_cast %11 : vector<128x128xbf16> to vector<16x8x128xbf16>
    %13 = vector.extract_strided_slice %6 {offsets = [0, 256], sizes = [128, 128], strides = [1, 1]} : vector<128x384xf32> to vector<128x128xf32>
    %14 = arith.truncf %13 : vector<128x128xf32> to vector<128x128xbf16>
    %15 = vector.shape_cast %14 : vector<128x128xbf16> to vector<16x8x128xbf16>
    "tpu.trace_start"() <{level = 10 : i32, message = "bqh,bkh->bqk"}> : () -> ()
    %cst_6 = arith.constant dense<0.000000e+00> : vector<16x8x8xf32>
    %16 = tpu.matmul %9, %12, %cst_6 {dimension_numbers = #tpu.dot_dimension_numbers<[2], [2], [1], [1], [0, 0, 0, 1, 1, 1], [0], [0]>} : vector<16x8x128xbf16>, vector<16x8x128xbf16>, vector<16x8x8xf32> -> vector<16x8x8xf32>
    "tpu.trace_stop"() : () -> ()
    %cst_7 = arith.constant dense<0xFF800000> : vector<16x8xf32>
    %17 = vector.multi_reduction <maximumf>, %16, %cst_7 [2] : vector<16x8x8xf32> to vector<16x8xf32>
    %18 = vector.shape_cast %17 : vector<16x8xf32> to vector<16x8x1xf32>
    %19 = vector.broadcast %18 : vector<16x8x1xf32> to vector<16x8x8xf32>
    %20 = arith.subf %16, %19 : vector<16x8x8xf32>
    %21 = math.exp %20 : vector<16x8x8xf32>
    %cst_8 = arith.constant dense<0.000000e+00> : vector<16x8xf32>
    %22 = vector.multi_reduction <add>, %21, %cst_8 [2] : vector<16x8x8xf32> to vector<16x8xf32>
    %23 = vector.shape_cast %22 : vector<16x8xf32> to vector<16x8x1xf32>
    %24 = tpu.reciprocal %23 {approx = true} : vector<16x8x1xf32> -> vector<16x8x1xf32>
    %25 = arith.mulf %23, %24 : vector<16x8x1xf32>
    %cst_9 = arith.constant 2.000000e+00 : f32
    %26 = vector.broadcast %cst_9 : f32 to vector<16x8x1xf32>
    %27 = arith.subf %26, %25 : vector<16x8x1xf32>
    %28 = arith.mulf %24, %27 : vector<16x8x1xf32>
    %29 = arith.truncf %21 : vector<16x8x8xf32> to vector<16x8x8xbf16>
    "tpu.trace_start"() <{level = 10 : i32, message = "bqk,bkh->bqh"}> : () -> ()
    %cst_10 = arith.constant dense<0.000000e+00> : vector<16x8x128xf32>
    %30 = tpu.matmul %29, %15, %cst_10 {dimension_numbers = #tpu.dot_dimension_numbers<[2], [1], [1], [2], [0, 0, 0, 1, 1, 2], [0], [0]>} : vector<16x8x8xbf16>, vector<16x8x128xbf16>, vector<16x8x128xf32> -> vector<16x8x128xf32>
    "tpu.trace_stop"() : () -> ()
    %31 = vector.broadcast %28 : vector<16x8x1xf32> to vector<16x8x128xf32>
    %32 = arith.mulf %30, %31 : vector<16x8x128xf32>
    %c0_11 = arith.constant 0 : index
    %c0_12 = arith.constant 0 : index
    %c0_13 = arith.constant 0 : index
    %33 = vector.load %arg4[%c0_11, %c0_12, %c0_13] : memref<16x8x128xf32, #tpu.memory_space<vmem>>, vector<16x8x128xf32>
    tpu.vector_store %arg4[%c0_11, %c0_12, %c0_13], %32 {strides = array<i32>} : memref<16x8x128xf32, #tpu.memory_space<vmem>>, vector<16x8x128xf32>,
    return
  }
  func.func @transform_0(%arg0: i32) -> (i32, i32, i32) {
    %c0_i32 = arith.constant 0 : i32
    %c0_i32_0 = arith.constant 0 : i32
    %c0_i32_1 = arith.constant 0 : i32
    return %arg0, %c0_i32, %c0_i32_0 : i32, i32, i32
  }
  func.func @transform_1(%arg0: i32) -> (i32, i32) {
    %c0_i32 = arith.constant 0 : i32
    %c0_i32_0 = arith.constant 0 : i32
    %c0_i32_1 = arith.constant 0 : i32
    return %c0_i32, %c0_i32_0 : i32, i32
  }
  func.func @transform_2(%arg0: i32) -> (i32, i32) {
    %c0_i32 = arith.constant 0 : i32
    %c0_i32_0 = arith.constant 0 : i32
    %c0_i32_1 = arith.constant 0 : i32
    return %c0_i32, %c0_i32_0 : i32, i32
  }
  func.func @transform_3(%arg0: i32) -> (i32, i32, i32) {
    %c0_i32 = arith.constant 0 : i32
    %c0_i32_0 = arith.constant 0 : i32
    %c0_i32_1 = arith.constant 0 : i32
    return %arg0, %c0_i32, %c0_i32_0 : i32, i32, i32
  }
}

</mosaic_0001>

<bundles_post_ra>
// kernel: tpu_custom_call.1
= control target key start
LH: loop header
LB: loop body
LE: loop exit
PB: predicated region body
PF: predicated region fallthrough
CT: control target
= control target key end

     0   :  { %8 = vsyncpa [#allocation3], 0  ;;  %s3378_s0 = inlined_call_operand.hbm [shape: bf16[16,8,128], index: 0, kind: input, shape index: {}]   ;;  %s3379_s1 = inlined_call_operand.hbm [shape: bf16[128,384], index: 1, kind: input, shape index: {}]   ;;  %s3380_s2 = inlined_call_operand.vmem [shape: f32[1,384], index: 2, kind: input, shape index: {}]   ;;  %s3381_s3 = inlined_call_operand.hbm [shape: f32[16,8,128], index: 3, kind: output, shape index: {}]  }
   0x1   :  { %9 = vsyncpa [#allocation6], 0 }
   0x2   :  { %10 = vsyncpa [#allocation4], 0  ;;  %s2959_s12 = smov [#allocation2]   ;;  %s2887_s16 = scalar_lea.hbm %s3378_s0, 1024 }
   0x3   :  { %s16_s13 = sshll.u32 %s2959_s12, 4  ;;  %p2888_p0 = scmp.ne.s32.totalorder %s3378_s0, %s2887_s16  ;;  %s17_s13 = int_to_ptr.vmem [resolvable:$true] %s16_s13 }
   0x4   :  { %p2891_p1 = scmp.lt.u32.totalorder %s2887_s16, %s3378_s0 }
   0x6   :  { %p2893_p2 = pnand %p2891_p1, %p2888_p0 }
   0x8   :  { %2896 = shalt.err (!%p2893_p2)
}
   0x9   :  { %s2897_s21 = scalar_lea.vmem %s17_s13, 1024  ;;  %p2902_p4 = scmp.lt.s32.totalorder %s17_s13, %s17_s13 }
   0xa   :  { %p2898_p3 = scmp.ne.s32.totalorder %s17_s13, %s2897_s21  ;;  %p2903_p5 = scmp.lt.s32.totalorder %s2897_s21, %s2897_s21 }
   0xc   :  { %p2904_p6 = por %p2903_p5, %p2902_p4 }
   0xe   :  { %p2905_p7 = pnand %p2904_p6, %p2898_p3 }
  0x10   :  { %2908 = shalt.err (!%p2905_p7)
}
  0x11   :  { %s2960_s22 = smov 64   ;;  %s2961_s23 = smov 4  }
  0x12   :  { %22 = dma.hbm_to_vmem [thread:$0]  %s3378_s0, 1024, %s17_s13, [#allocation3], %s2960_s22, %s2960_s22, %s2961_s23  }
  0x13   :  { %s2962_s26 = smov [#allocation5]   ;;  %s2909_s30 = scalar_lea.hbm %s3379_s1, 3072 }
  0x14   :  { %s28_s27 = sshll.u32 %s2962_s26, 4  ;;  %p2910_p8 = scmp.ne.s32.totalorder %s3379_s1, %s2909_s30  ;;  %s29_s27 = int_to_ptr.vmem [resolvable:$true] %s28_s27 }
  0x15   :  { %p2913_p9 = scmp.lt.u32.totalorder %s2909_s30, %s3379_s1 }
  0x17   :  { %p2915_p10 = pnand %p2913_p9, %p2910_p8 }
  0x19   :  { %2918 = shalt.err (!%p2915_p10)
}
  0x1a   :  { %s2919_s8 = scalar_lea.vmem %s29_s27, 3072  ;;  %p2924_p12 = scmp.lt.s32.totalorder %s29_s27, %s29_s27 }
  0x1b   :  { %p2920_p11 = scmp.ne.s32.totalorder %s29_s27, %s2919_s8  ;;  %p2925_p13 = scmp.lt.s32.totalorder %s2919_s8, %s2919_s8 }
  0x1d   :  { %p2926_p0 = por %p2925_p13, %p2924_p12 }
  0x1f   :  { %p2927_p1 = pnand %p2926_p0, %p2920_p11 }
  0x21   :  { %2930 = shalt.err (!%p2927_p1)
}
  0x22   :  { %s2963_s0 = smov 192   ;;  %s2964_s9 = smov 12  }
  0x23   :  { %34 = dma.hbm_to_vmem [thread:$0]  %s3379_s1, 3072, %s29_s27, [#allocation6], %s2963_s0, %s2963_s0, %s2964_s9  }
  0x24   :  { %2953 = dma.done.wait [#allocation3], 1024  }
  0x25   :  { %2954 = vsyncadd [#allocation3], 4294966272 }
  0x26   :  { %2955 = dma.done.wait [#allocation6], 3072  }
  0x27   :  { %2956 = vsyncadd [#allocation6], 4294964224  ;;  %v2965_v0 = vmov 0   ;;  %v2783_v1 = vld [vmem:[#allocation5 + $0x4] ss:$12 sps:$4 sm:$0xff]   ;;  %v2808_v24 = vld [vmem:[#allocation2 + $0x8] sm:$0xff]   ;;  %v94_v34 = vlaneseq }
  0x28   :  { %317 = vmatprep.mubr.bf16.mxu0 %v2965_v0  ;;  %v2785_v2 = vld [vmem:[#allocation5] ss:$12 sps:$4 sm:$0xff]   ;;  %285 = vmatprep.subr.bf16.mxu0 %v2783_v1  ;;  %v2786_v3 = vld [vmem:[#allocation5 + $0x1c] ss:$12 sps:$4 sm:$0xff]   ;;  %v2788_v4 = vld [vmem:[#allocation5 + $0x18] ss:$12 sps:$4 sm:$0xff]  }
  0x29   :  { %286 = vmatpush1.bf16.msra.mxu0 %v2785_v2  ;;  %v2789_v5 = vld [vmem:[#allocation5 + $0x34] ss:$12 sps:$4 sm:$0xff]   ;;  %v2791_v6 = vld [vmem:[#allocation5 + $0x30] ss:$12 sps:$4 sm:$0xff]   ;;  %v2792_v7 = vld [vmem:[#allocation5 + $0x4c] ss:$12 sps:$4 sm:$0xff]  }
  0x2a   :  { %287 = vmatprep.subr.bf16.mxu0 %v2786_v3  ;;  %v2794_v8 = vld [vmem:[#allocation5 + $0x48] ss:$12 sps:$4 sm:$0xff]   ;;  %v2807_v9 = vld [vmem:[#allocation2] sm:$0xff]   ;;  %v2803_v17 = vld [vmem:[#allocation5 + $0x90] ss:$12 sps:$4 sm:$0xff]   ;;  %v2966_v33 = vmov 0.0  }
  0x2b   :  { %v2795_v10 = vld [vmem:[#allocation5 + $0x64] ss:$12 sps:$4 sm:$0xff]   ;;  %2563 = vmatprep.mubr.bf16.mxu1 %v2807_v9  ;;  %v2797_v11 = vld [vmem:[#allocation5 + $0x60] ss:$12 sps:$4 sm:$0xff]   ;;  %v2798_v12 = vld [vmem:[#allocation5 + $0x7c] ss:$12 sps:$4 sm:$0xff]  }
  0x2c   :  { %v2800_v13 = vld [vmem:[#allocation5 + $0x78] ss:$12 sps:$4 sm:$0xff]   ;;  %v2801_v14 = vld [vmem:[#allocation5 + $0x94] ss:$12 sps:$4 sm:$0xff]   ;;  %v2818_v21 = vld [vmem:[#allocation5 + $0x50] ss:$12 sps:$4 sm:$0xff]  }
  0x2d   :  { %288 = vmatpush1.bf16.msra.mxu0 %v2788_v4  ;;  %v2815_v15 = vld [vmem:[#allocation5 + $0x8] ss:$12 sps:$4 sm:$0xff]   ;;  %v2816_v16 = vld [vmem:[#allocation5 + $0x20] ss:$12 sps:$4 sm:$0xff]   ;;  %v2817_v18 = vld [vmem:[#allocation5 + $0x38] ss:$12 sps:$4 sm:$0xff]  }
  0x2e   :  { %289 = vmatprep.subr.bf16.mxu0 %v2789_v5  ;;  %2547 = vmatprep.subr.bf16.mxu1 %v2815_v15  ;;  %v2804_v19 = vld [vmem:[#allocation5 + $0xac] ss:$12 sps:$4 sm:$0xff]   ;;  %v2806_v20 = vld [vmem:[#allocation5 + $0xa8] ss:$12 sps:$4 sm:$0xff]   ;;  %v2822_v26 = vld [vmem:[#allocation5 + $0xb0] ss:$12 sps:$4 sm:$0xff]  }
  0x2f   :  { %2548 = vmatpush3.bf16.msra.mxu1 %v2815_v15  ;;  %v2819_v22 = vld [vmem:[#allocation5 + $0x68] ss:$12 sps:$4 sm:$0xff]   ;;  %v2820_v23 = vld [vmem:[#allocation5 + $0x80] ss:$12 sps:$4 sm:$0xff]   ;;  %v2821_v25 = vld [vmem:[#allocation5 + $0x98] ss:$12 sps:$4 sm:$0xff]  }
  0x30   :  { %2549 = vmatprep.subr.bf16.mxu1 %v2816_v16  ;;  %v2809_v27 = vld [vmem:[#allocation2 + $0x10] sm:$0xff]   ;;  %v2810_v28 = vld [vmem:[#allocation2 + $0x18] sm:$0xff]   ;;  %v2811_v29 = vld [vmem:[#allocation2 + $0x20] sm:$0xff]   ;;  %vm2967_vm0 = vmmov 0   ;;  %v95_v35 = vshrl.u32 %v94_v34, 7  ;;  %vm1539_vm1 = vcmask 1043456  }
  0x31   :  { %290 = vmatpush1.bf16.msra.mxu0 %v2791_v6  ;;  %v2812_v30 = vld [vmem:[#allocation2 + $0x28] sm:$0xff]   ;;  %v2813_v31 = vld [vmem:[#allocation2 + $0x30] sm:$0xff]   ;;  %v2814_v32 = vld [vmem:[#allocation2 + $0x38] sm:$0xff]   ;;  %vm1311_vm2 = vcmask 64512  }
  0x32   :  { %291 = vmatprep.subr.bf16.mxu0 %v2792_v7  ;;  %v104_v36 = vsub.s32 2, %v95_v35  ;;  %v92_v37 = vld [vmem:[%s3380_s2] sm:$0x7]  ;;  %v100_v39 = vsub.s32 1, %v95_v35  ;;  %v96_v41 = vsub.s32 0, %v95_v35  ;;  %s2968_s2 = smov [#allocation7]  }
  0x33   :  { %2550 = vmatpush3.bf16.msra.mxu1 %v2816_v16  ;;  %s2310_s13 = sshll.u32 %s2968_s2, 4  ;;  %s2311_s13 = int_to_ptr.vmem [resolvable:$true] %s2310_s13 }
  0x34   :  { %2551 = vmatprep.subr.bf16.mxu1 %v2817_v18  ;;  %v3032_v38 = vrot.slane %v92_v37, %v104_v36  ;;  %v3034_v40 = vrot.slane %v92_v37, %v100_v39  ;;  %v3037_v46 = vrot.slane %v92_v37, %v96_v41  ;;  %s2931_s14 = scalar_lea.vmem %s2311_s13, 2048  ;;  %p2936_p3 = scmp.lt.s32.totalorder %s2311_s13, %s2311_s13 }
  0x35   :  { %292 = vmatpush1.bf16.msra.mxu0 %v2794_v8  ;;  %p2932_p2 = scmp.ne.s32.totalorder %s2311_s13, %s2931_s14  ;;  %p2937_p4 = scmp.lt.s32.totalorder %s2931_s14, %s2931_s14 }
  0x36   :  { %293 = vmatprep.subr.bf16.mxu0 %v2795_v10 }
  0x37   :  { %2552 = vmatpush3.bf16.msra.mxu1 %v2817_v18  ;;  %p2938_p5 = por %p2937_p4, %p2936_p3 }
  0x38   :  { %2553 = vmatprep.subr.bf16.mxu1 %v2818_v21 }
  0x39   :  { %294 = vmatpush1.bf16.msra.mxu0 %v2797_v11  ;;  %p2939_p6 = pnand %p2938_p5, %p2932_p2 }
  0x3a   :  { %295 = vmatprep.subr.bf16.mxu0 %v2798_v12 }
  0x3b   :  { %2554 = vmatpush3.bf16.msra.mxu1 %v2818_v21 }
  0x3c   :  { %2555 = vmatprep.subr.bf16.mxu1 %v2819_v22 }
  0x3d   :  { %296 = vmatpush1.bf16.msra.mxu0 %v2800_v13 }
  0x3e   :  { %297 = vmatprep.subr.bf16.mxu0 %v2801_v14 }
  0x3f   :  { %2556 = vmatpush3.bf16.msra.mxu1 %v2819_v22 }
  0x40   :  { %2557 = vmatprep.subr.bf16.mxu1 %v2820_v23 }
  0x41   :  { %298 = vmatpush1.bf16.msra.mxu0 %v2803_v17 }
  0x42   :  { %299 = vmatprep.subr.bf16.mxu0 %v2804_v19 }
  0x43   :  { %2558 = vmatpush3.bf16.msra.mxu1 %v2820_v23 }
  0x44   :  { %2559 = vmatprep.subr.bf16.mxu1 %v2821_v25 }
  0x45   :  { %300 = vmatpush1.bf16.msra.mxu0 %v2806_v20 }
  0x46   :  { %2603 = vmatprep.subr.bf16.mxu0 %v2966_v33 }
  0x47   :  { %2560 = vmatpush3.bf16.msra.mxu1 %v2821_v25 }
  0x48   :  { %318 = vmatmul.mubr.bf16.vlgmr.msra.gmra.mrb[0].mxu0 %v2807_v9  ;;  %2561 = vmatprep.subr.bf16.mxu1 %v2822_v26 }
  0x49   :  { %327 = vmatprep.mubr.bf16.mxu0 %v2965_v0 }
  0x4b   :  { %2562 = vmatpush3.bf16.msra.mxu1 %v2822_v26 }
  0x4c   :  { %2579 = vmatprep.subr.bf16.mxu1 %v2966_v33 }
  0x4e   :  { %2564 = vmatmul.mubr.bf16.vlgmr.msra.gmra.mrb[0].mxu1 %v2808_v24 }
  0x4f   :  { %2567 = vmatprep.mubr.bf16.mxu1 %v2809_v27 }
  0x50   :  { %328 = vmatmul.mubr.bf16.gmra.mrb[4].mxu0 %v2808_v24 }
  0x51   :  { %337 = vmatprep.mubr.bf16.mxu0 %v2965_v0 }
  0x56   :  { %2568 = vmatmul.mubr.bf16.gmra.mrb[4].mxu1 %v2810_v28 }
  0x57   :  { %2571 = vmatprep.mubr.bf16.mxu1 %v2811_v29 }
  0x58   :  { %338 = vmatmul.mubr.bf16.gmra.mrb[8].mxu0 %v2809_v27 }
  0x59   :  { %347 = vmatprep.mubr.bf16.mxu0 %v2965_v0 }
  0x5e   :  { %2572 = vmatmul.mubr.bf16.gmra.mrb[8].mxu1 %v2812_v30 }
  0x5f   :  { %2575 = vmatprep.mubr.bf16.mxu1 %v2813_v31 }
  0x60   :  { %348 = vmatmul.mubr.bf16.gmra.mrb[12].mxu0 %v2810_v28 }
  0x61   :  { %357 = vmatprep.mubr.bf16.mxu0 %v2965_v0 }
  0x66   :  { %2576 = vmatmul.mubr.bf16.gmra.mrb[12].mxu1 %v2814_v32 }
  0x67   :  { %2581 = vmatprep.mubr.msk.bf16.mxu1 %vm2967_vm0, %v2966_v33 }
  0x68   :  { %358 = vmatmul.mubr.bf16.gmra.mrb[16].mxu0 %v2811_v29 }
  0x69   :  { %367 = vmatprep.mubr.bf16.mxu0 %v2965_v0 }
  0x70   :  { %368 = vmatmul.mubr.bf16.gmra.mrb[20].mxu0 %v2812_v30 }
  0x71   :  { %377 = vmatprep.mubr.bf16.mxu0 %v2965_v0 }
  0x78   :  { %378 = vmatmul.mubr.bf16.gmra.mrb[24].mxu0 %v2813_v31 }
  0x79   :  { %387 = vmatprep.mubr.bf16.mxu0 %v2965_v0 }
  0x80   :  { %388 = vmatmul.mubr.bf16.gmra.mrb[28].mxu0 %v2814_v32 }
  0x81   :  { %2605 = vmatprep.mubr.msk.bf16.mxu0 %vm2967_vm0, %v2966_v33 }
 0x11b   :  { %v319_v42 = vpop.f32.mrb[0].mxu0 }
 0x11c   :  { %v321_v43 = vpop.f32.mrb[1].mxu0  ;;  %v320_v49 = vadd.f32 %v319_v42, %v3037_v46 }
 0x11d   :  { %v322_v44 = vadd.f32 %v321_v43, %v3034_v40  ;;  %v323_v45 = vpop.f32.mrb[2].mxu0 }
 0x11e   :  { %v325_v47 = vpop.f32.mrb[3].mxu0  ;;  %v2419_v54 = vpack.c.bf16 %v320_v49, %v320_v49  ;;  %v324_v58 = vadd.f32 %v323_v45, %v3037_v46 }
 0x11f   :  { %v2435_v48 = vpack.c.bf16 %v322_v44, %v322_v44  ;;  %v326_v50 = vadd.f32 %v325_v47, %v3034_v40 }
 0x120   :  { %v2420_v0 = vpack.c.bf16 %v324_v58, %v324_v58 }
 0x121   :  { %2580 = vmatpush3.bf16.xpose.msra.mxu1 %v2435_v48  ;;  %v2436_v56 = vpack.c.bf16 %v326_v50, %v326_v50  ;;  %v2565_v2 = vpop.f32.mrb[0].mxu1 }
 0x122   :  { %2585 = vmatprep.subr.bf16.mxu1 %v2966_v33  ;;  %v441_v4 = vadd.f32 %v2565_v2, %v3032_v38  ;;  %v432_v5 = vpop.f32.mrb[1].mxu1 }
 0x123   :  { %v329_v51 = vpop.f32.mrb[4].mxu0  ;;  %v3053_v7 = vadd.f32 %v432_v5, %v3032_v38  ;;  %v2566_v8 = vpop.f32.mrb[2].mxu1 }
 0x124   :  { %v331_v52 = vpop.f32.mrb[5].mxu0  ;;  %v2453_v9 = vpack.c.bf16 %v441_v4, %v441_v4  ;;  %v444_v10 = vadd.f32 %v2566_v8, %v3032_v38  ;;  %v435_v11 = vpop.f32.mrb[3].mxu1  ;;  %v330_v12 = vadd.f32 %v329_v51, %v3037_v46 }
 0x125   :  { %v333_v53 = vpop.f32.mrb[6].mxu0  ;;  %v332_v57 = vadd.f32 %v331_v52, %v3034_v40  ;;  %v3061_v13 = vadd.f32 %v435_v11, %v3032_v38 }
 0x126   :  { %v335_v55 = vpop.f32.mrb[7].mxu0  ;;  %v3066_v16 = vsel %vm1539_vm1, %v2453_v9, 0  ;;  %v2454_v17 = vpack.c.bf16 %v444_v10, %v444_v10  ;;  %v2421_v23 = vpack.c.bf16 %v330_v12, %v330_v12  ;;  %v334_v37 = vadd.f32 %v333_v53, %v3037_v46 }
 0x127   :  { %v2437_v61 = vpack.c.bf16 %v332_v57, %v332_v57  ;;  %v336_v14 = vadd.f32 %v335_v55, %v3034_v40 }
 0x128   :  { %2582 = vmatmul.mubr.bf16.vlgmr.msra.gmra.mrb[16].mxu1 %v2419_v54  ;;  %v3072_v22 = vsel %vm1539_vm1, %v2454_v17, 0  ;;  %v2422_v54 = vpack.c.bf16 %v334_v37, %v334_v37 }
 0x129   :  { %2586 = vmatpush3.bf16.xpose.msra.mxu1 %v2436_v56  ;;  %2587 = vmatprep.mubr.msk.bf16.mxu1 %vm2967_vm0, %v2966_v33  ;;  %v2569_v25 = vpop.f32.mrb[4].mxu1  ;;  %v2438_v26 = vpack.c.bf16 %v336_v14, %v336_v14 }
 0x12a   :  { %2591 = vmatprep.subr.bf16.mxu1 %v2966_v33  ;;  %v457_v28 = vadd.f32 %v2569_v25, %v3032_v38  ;;  %v448_v29 = vpop.f32.mrb[5].mxu1 }
 0x12b   :  { %v339_v59 = vpop.f32.mrb[8].mxu0  ;;  %v449_v31 = vadd.f32 %v448_v29, %v3032_v38  ;;  %v2570_v32 = vpop.f32.mrb[6].mxu1 }
 0x12c   :  { %v341_v60 = vpop.f32.mrb[9].mxu0  ;;  %v340_v6 = vadd.f32 %v339_v59, %v3037_v46  ;;  %v2457_v34 = vpack.c.bf16 %v457_v28, %v457_v28  ;;  %v460_v35 = vadd.f32 %v2570_v32, %v3032_v38  ;;  %v451_v36 = vpop.f32.mrb[7].mxu1 }
 0x12d   :  { %v342_v62 = vadd.f32 %v341_v60, %v3034_v40  ;;  %v3048_v63 = vpop.f32.mrb[10].mxu0  ;;  %v2455_v39 = vpack.c.bf16 %v449_v31, %v449_v31  ;;  %v452_v41 = vadd.f32 %v451_v36, %v3032_v38 }
 0x12e   :  { %v345_v1 = vpop.f32.mrb[11].mxu0  ;;  %v2423_v18 = vpack.c.bf16 %v340_v6, %v340_v6  ;;  %v3088_v44 = vsel %vm1539_vm1, %v2457_v34, 0  ;;  %v2458_v45 = vpack.c.bf16 %v460_v35, %v460_v35  ;;  %v344_v5 = vadd.f32 %v3048_v63, %v3037_v46 }
 0x12f   :  { %v2439_v3 = vpack.c.bf16 %v342_v62, %v342_v62  ;;  %v346_v42 = vadd.f32 %v345_v1, %v3034_v40  ;;  %v3091_v49 = vsel %vm1539_vm1, %v2455_v39, 0  ;;  %v2456_v50 = vpack.c.bf16 %v452_v41, %v452_v41 }
 0x130   :  { %2588 = vmatmul.mubr.bf16.vlgmr.msra.gmra.mrb[20].mxu1 %v2420_v0  ;;  %v3097_v53 = vsel %vm1539_vm1, %v2458_v45, 0 }
 0x131   :  { %2592 = vmatpush3.bf16.xpose.msra.mxu1 %v2437_v61  ;;  %2604 = vmatpush3.bf16.xpose.msra.mxu0 %v2439_v3  ;;  %v3100_v56 = vsel %vm1539_vm1, %v2456_v50, 0  ;;  %v2573_v57 = vpop.f32.mrb[8].mxu1  ;;  %v2440_v58 = vpack.c.bf16 %v346_v42, %v346_v42 }
 0x132   :  { %2593 = vmatprep.mubr.msk.bf16.mxu1 %vm2967_vm0, %v2966_v33  ;;  %2597 = vmatprep.subr.bf16.mxu1 %v2966_v33  ;;  %v473_v60 = vadd.f32 %v2573_v57, %v3032_v38  ;;  %v464_v61 = vpop.f32.mrb[9].mxu1 }
 0x133   :  { %v349_v15 = vpop.f32.mrb[12].mxu0  ;;  %2615 = vmatprep.subr.bf16.mxu0 %v2966_v33  ;;  %v465_v0 = vadd.f32 %v464_v61, %v3032_v38  ;;  %v2574_v1 = vpop.f32.mrb[10].mxu1 }
 0x134   :  { %v351_v19 = vpop.f32.mrb[13].mxu0  ;;  %v350_v30 = vadd.f32 %v349_v15, %v3037_v46  ;;  %v2461_v2 = vpack.c.bf16 %v473_v60, %v473_v60  ;;  %v476_v3 = vadd.f32 %v2574_v1, %v3032_v38  ;;  %v467_v4 = vpop.f32.mrb[11].mxu1 }
 0x135   :  { %v352_v20 = vadd.f32 %v351_v19, %v3034_v40  ;;  %v3069_v21 = vpop.f32.mrb[14].mxu0  ;;  %v2459_v6 = vpack.c.bf16 %v465_v0, %v465_v0  ;;  %v468_v8 = vadd.f32 %v467_v4, %v3032_v38 }
 0x136   :  { %v355_v24 = vpop.f32.mrb[15].mxu0  ;;  %v2425_v47 = vpack.c.bf16 %v350_v30, %v350_v30  ;;  %v3117_v11 = vsel %vm1539_vm1, %v2461_v2, 0  ;;  %v2462_v63 = vpack.c.bf16 %v476_v3, %v476_v3  ;;  %v354_v39 = vadd.f32 %v3069_v21, %v3037_v46 }
 0x137   :  { %v2441_v27 = vpack.c.bf16 %v352_v20, %v352_v20  ;;  %v356_v9 = vadd.f32 %v355_v24, %v3034_v40  ;;  %v3120_v15 = vsel %vm1539_vm1, %v2459_v6, 0  ;;  %v2460_v17 = vpack.c.bf16 %v468_v8, %v468_v8 }
 0x138   :  { %2594 = vmatmul.mubr.bf16.vlgmr.msra.gmra.mrb[24].mxu1 %v2421_v23  ;;  %2606 = vmatmul.mubr.bf16.vlgmr.msra.gmra.mrb[32].mxu0 %v2423_v18  ;;  %v3126_v20 = vsel %vm1539_vm1, %v2462_v63, 0  ;;  %v2424_v23 = vpack.c.bf16 %v344_v5, %v344_v5 }
 0x139   :  { %2598 = vmatpush3.bf16.xpose.msra.mxu1 %v2438_v26  ;;  %2616 = vmatpush3.bf16.xpose.msra.mxu0 %v2441_v27  ;;  %v3129_v25 = vsel %vm1539_vm1, %v2460_v17, 0  ;;  %v2577_v26 = vpop.f32.mrb[12].mxu1  ;;  %v2442_v27 = vpack.c.bf16 %v356_v9, %v356_v9 }
 0x13a   :  { %2599 = vmatprep.mubr.msk.bf16.mxu1 %vm2967_vm0, %v2966_v33  ;;  %2617 = vmatprep.mubr.msk.bf16.mxu0 %vm2967_vm0, %v2966_v33  ;;  %v489_v29 = vadd.f32 %v2577_v26, %v3032_v38  ;;  %v480_v30 = vpop.f32.mrb[13].mxu1 }
 0x13b   :  { %v359_v43 = vpop.f32.mrb[16].mxu0  ;;  %2609 = vmatprep.subr.bf16.mxu1 %v2966_v33  ;;  %2627 = vmatprep.subr.bf16.mxu0 %v2966_v33  ;;  %v481_v32 = vadd.f32 %v480_v30, %v3032_v38  ;;  %v2578_v34 = vpop.f32.mrb[14].mxu1 }
 0x13c   :  { %v361_v48 = vpop.f32.mrb[17].mxu0  ;;  %v360_v62 = vadd.f32 %v359_v43, %v3037_v46  ;;  %v2465_v35 = vpack.c.bf16 %v489_v29, %v489_v29  ;;  %v492_v36 = vadd.f32 %v2578_v34, %v3032_v38  ;;  %v483_v37 = vpop.f32.mrb[15].mxu1 }
 0x13d   :  { %v362_v51 = vadd.f32 %v361_v48, %v3034_v40  ;;  %v3094_v52 = vpop.f32.mrb[18].mxu0  ;;  %v2463_v41 = vpack.c.bf16 %v481_v32, %v481_v32  ;;  %v484_v42 = vadd.f32 %v483_v37, %v3032_v38 }
 0x13e   :  { %v365_v55 = vpop.f32.mrb[19].mxu0  ;;  %v2427_v12 = vpack.c.bf16 %v360_v62, %v360_v62  ;;  %v2466_v21 = vpack.c.bf16 %v492_v36, %v492_v36  ;;  %v364_v3 = vadd.f32 %v3094_v52, %v3037_v46 }
 0x13f   :  { %v2443_v59 = vpack.c.bf16 %v362_v51, %v362_v51  ;;  %v366_v43 = vadd.f32 %v365_v55, %v3034_v40  ;;  %v3149_v51 = vsel %vm1539_vm1, %v2463_v41, 0 }
 0x140   :  { %2600 = vmatmul.mubr.bf16.vlgmr.msra.gmra.mrb[28].mxu1 %v2422_v54  ;;  %2618 = vmatmul.mubr.bf16.vlgmr.msra.gmra.mrb[36].mxu0 %v2425_v47  ;;  %v3146_v47 = vsel %vm1539_vm1, %v2465_v35, 0  ;;  %v2464_v54 = vpack.c.bf16 %v484_v42, %v484_v42  ;;  %v3153_v55 = vsel %vm1539_vm1, %v2466_v21, 0  ;;  %v2428_v63 = vpack.c.bf16 %v364_v3, %v364_v3 }
 0x141   :  { %2610 = vmatpush3.bf16.xpose.msra.mxu1 %v2440_v58  ;;  %2628 = vmatpush3.bf16.xpose.msra.mxu0 %v2443_v59  ;;  %v2426_v58 = vpack.c.bf16 %v354_v39, %v354_v39  ;;  %v2444_v62 = vpack.c.bf16 %v366_v43, %v366_v43 }
 0x142   :  { %2611 = vmatprep.mubr.msk.bf16.mxu1 %vm2967_vm0, %v2966_v33  ;;  %2629 = vmatprep.mubr.msk.bf16.mxu0 %vm2967_vm0, %v2966_v33  ;;  %v3157_v61 = vsel %vm1539_vm1, %v2464_v54, 0 }
 0x143   :  { %v369_v10 = vpop.f32.mrb[20].mxu0  ;;  %2621 = vmatprep.subr.bf16.mxu1 %v2966_v33  ;;  %2639 = vmatprep.subr.bf16.mxu0 %v2966_v33 }
 0x144   :  { %v371_v14 = vpop.f32.mrb[21].mxu0  ;;  %v370_v31 = vadd.f32 %v369_v10, %v3037_v46 }
 0x145   :  { %v372_v18 = vadd.f32 %v371_v14, %v3034_v40  ;;  %v3123_v19 = vpop.f32.mrb[22].mxu0 }
 0x146   :  { %v375_v24 = vpop.f32.mrb[23].mxu0  ;;  %v2429_v48 = vpack.c.bf16 %v370_v31, %v370_v31 }
 0x147   :  { %v2445_v28 = vpack.c.bf16 %v372_v18, %v372_v18  ;;  %v376_v4 = vadd.f32 %v375_v24, %v3034_v40  ;;  %v374_v24 = vadd.f32 %v3123_v19, %v3037_v46  ;;  %v2452_v19 = vpack.c.bf16 %v3061_v13, %v3061_v13 }
 0x148   :  { %2612 = vmatmul.mubr.bf16.vlgmr.msra.gmra.mrb[32].mxu1 %v2424_v23  ;;  %2630 = vmatmul.mubr.bf16.vlgmr.msra.gmra.mrb[40].mxu0 %v2427_v12 }
 0x149   :  { %2622 = vmatpush3.bf16.xpose.msra.mxu1 %v2442_v27  ;;  %2640 = vmatpush3.bf16.xpose.msra.mxu0 %v2445_v28  ;;  %v2446_v14 = vpack.c.bf16 %v376_v4, %v376_v4  ;;  %v2430_v27 = vpack.c.bf16 %v374_v24, %v374_v24  ;;  %v1587_v31 = vsel %vm1539_vm1, %v2452_v19, 0 }
 0x14a   :  { %2623 = vmatprep.mubr.msk.bf16.mxu1 %vm2967_vm0, %v2966_v33  ;;  %2641 = vmatprep.mubr.msk.bf16.mxu0 %vm2967_vm0, %v2966_v33 }
 0x14b   :  { %v379_v45 = vpop.f32.mrb[24].mxu0  ;;  %2633 = vmatprep.subr.bf16.mxu1 %v2966_v33  ;;  %2651 = vmatprep.subr.bf16.mxu0 %v2966_v33 }
 0x14c   :  { %v381_v50 = vpop.f32.mrb[25].mxu0  ;;  %v380_v2 = vadd.f32 %v379_v45, %v3037_v46 }
 0x14d   :  { %v382_v57 = vadd.f32 %v381_v50, %v3034_v40  ;;  %v383_v38 = vpop.f32.mrb[26].mxu0 }
 0x14e   :  { %v384_v59 = vadd.f32 %v383_v38, %v3037_v46  ;;  %v385_v60 = vpop.f32.mrb[27].mxu0  ;;  %v2431_v6 = vpack.c.bf16 %v380_v2, %v380_v2 }
 0x14f   :  { %v2447_v0 = vpack.c.bf16 %v382_v57, %v382_v57  ;;  %v386_v1 = vadd.f32 %v385_v60, %v3034_v40 }
 0x150   :  { %2624 = vmatmul.mubr.bf16.vlgmr.msra.gmra.mrb[36].mxu1 %v2426_v58  ;;  %2642 = vmatmul.mubr.bf16.vlgmr.msra.gmra.mrb[44].mxu0 %v2429_v48 }
 0x151   :  { %2634 = vmatpush3.bf16.xpose.msra.mxu1 %v2444_v62  ;;  %2652 = vmatpush3.bf16.xpose.msra.mxu0 %v2447_v0  ;;  %v2448_v28 = vpack.c.bf16 %v386_v1, %v386_v1 }
 0x152   :  { %2635 = vmatprep.mubr.msk.bf16.mxu1 %vm2967_vm0, %v2966_v33  ;;  %2653 = vmatprep.mubr.msk.bf16.mxu0 %vm2967_vm0, %v2966_v33 }
 0x153   :  { %v389_v5 = vpop.f32.mrb[28].mxu0  ;;  %2645 = vmatprep.subr.bf16.mxu1 %v2966_v33  ;;  %2663 = vmatprep.subr.bf16.mxu0 %v2966_v33 }
 0x154   :  { %v391_v8 = vpop.f32.mrb[29].mxu0  ;;  %v390_v23 = vadd.f32 %v389_v5, %v3037_v46 }
 0x155   :  { %v392_v9 = vadd.f32 %v391_v8, %v3034_v40  ;;  %v393_v10 = vpop.f32.mrb[30].mxu0 }
 0x156   :  { %v394_v52 = vadd.f32 %v393_v10, %v3037_v46  ;;  %v395_v12 = vpop.f32.mrb[31].mxu0  ;;  %v2433_v26 = vpack.c.bf16 %v390_v23, %v390_v23  ;;  %v2432_v46 = vpack.c.bf16 %v384_v59, %v384_v59 }
 0x157   :  { %v2449_v17 = vpack.c.bf16 %v392_v9, %v392_v9  ;;  %v396_v18 = vadd.f32 %v395_v12, %v3034_v40  ;;  %v2451_v40 = vpack.c.bf16 %v3053_v7, %v3053_v7 }
 0x158   :  { %2636 = vmatmul.mubr.bf16.vlgmr.msra.gmra.mrb[40].mxu1 %v2428_v63  ;;  %2654 = vmatmul.mubr.bf16.vlgmr.msra.gmra.mrb[48].mxu0 %v2431_v6  ;;  %v2434_v30 = vpack.c.bf16 %v394_v52, %v394_v52 }
 0x159   :  { %2646 = vmatpush3.bf16.xpose.msra.mxu1 %v2446_v14  ;;  %2664 = vmatpush3.bf16.xpose.msra.mxu0 %v2449_v17  ;;  %v1541_v29 = vsel %vm1539_vm1, %v2451_v40, 0  ;;  %v2450_v7 = vpack.c.bf16 %v396_v18, %v396_v18 }
 0x15a   :  { %2647 = vmatprep.mubr.msk.bf16.mxu1 %vm2967_vm0, %v2966_v33  ;;  %2665 = vmatprep.mubr.msk.bf16.mxu0 %vm2967_vm0, %v2966_v33 }
 0x15b   :  { %2657 = vmatprep.subr.bf16.mxu1 %v2966_v33  ;;  %2675 = vmatprep.subr.bf16.mxu0 %v2966_v33 }
 0x160   :  { %2648 = vmatmul.mubr.bf16.vlgmr.msra.gmra.mrb[44].mxu1 %v2430_v27  ;;  %2666 = vmatmul.mubr.bf16.vlgmr.msra.gmra.mrb[52].mxu0 %v2433_v26 }
 0x161   :  { %2658 = vmatpush3.bf16.xpose.msra.mxu1 %v2448_v28  ;;  %2659 = vmatprep.mubr.msk.bf16.mxu1 %vm2967_vm0, %v2966_v33 }
 0x162   :  { %2669 = vmatprep.subr.bf16.mxu1 %v2966_v33  ;;  %2676 = vmatpush3.bf16.msra.mxu0 %v1541_v29 }
 0x163   :  { %2677 = vmatprep.mubr.msk.bf16.mxu0 %vm2967_vm0, %v2966_v33  ;;  %2687 = vmatprep.subr.bf16.mxu0 %v2966_v33 }
 0x168   :  { %2660 = vmatmul.mubr.bf16.vlgmr.msra.gmra.mrb[48].mxu1 %v2432_v46 }
 0x169   :  { %2670 = vmatpush3.bf16.xpose.msra.mxu1 %v2450_v7  ;;  %2671 = vmatprep.mubr.msk.bf16.mxu1 %vm2967_vm0, %v2966_v33 }
 0x16a   :  { %2681 = vmatprep.subr.bf16.mxu1 %v2966_v33 }
 0x170   :  { %2672 = vmatmul.mubr.bf16.vlgmr.msra.gmra.mrb[52].mxu1 %v2434_v30 }
 0x171   :  { %2682 = vmatpush3.bf16.msra.mxu1 %v1587_v31  ;;  %2683 = vmatprep.mubr.msk.bf16.mxu1 %vm2967_vm0, %v2966_v33 }
 0x172   :  { %2693 = vmatprep.subr.bf16.mxu1 %v2966_v33 }
 0x1fb   :  { %v3200_v32 = vpop.f32.mrb[16].mxu1 }
 0x1fc   :  { %v2583_v34 = vpop.f32.mrb[17].mxu1  ;;  %v1312_v35 = vsel %vm1311_vm2, %v3200_v32, -inf }
 0x1fd   :  { %1313 = vmax.xlane.f32.xlu0 %v1312_v35  ;;  %v708_v13 = vpop.f32.mrb[18].mxu1 }
 0x1fe   :  { %v2584_v36 = vpop.f32.mrb[19].mxu1 }
 0x203   :  { %v3204_v37 = vpop.f32.mrb[20].mxu1 }
 0x204   :  { %v2589_v39 = vpop.f32.mrb[21].mxu1  ;;  %v1315_v41 = vsel %vm1311_vm2, %v3204_v37, -inf }
 0x205   :  { %1316 = vmax.xlane.f32.xlu0 %v1315_v41  ;;  %v748_v42 = vpop.f32.mrb[22].mxu1 }
 0x206   :  { %v2590_v43 = vpop.f32.mrb[23].mxu1 }
 0x20b   :  { %v3208_v45 = vpop.f32.mrb[24].mxu1  ;;  %v3210_v21 = vpop.f32.mrb[32].mxu0 }
 0x20c   :  { %v2595_v48 = vpop.f32.mrb[25].mxu1  ;;  %v2607_v50 = vpop.f32.mrb[33].mxu0  ;;  %v1324_v54 = vsel %vm1311_vm2, %v3210_v21, -inf  ;;  %v1318_v57 = vsel %vm1311_vm2, %v3208_v45, -inf }
 0x20d   :  { %v868_v38 = vpop.f32.mrb[34].mxu0  ;;  %1325 = vmax.xlane.f32.xlu0 %v1324_v54  ;;  %1319 = vmax.xlane.f32.xlu1 %v1318_v57  ;;  %v788_v58 = vpop.f32.mrb[26].mxu1 }
 0x20e   :  { %v2596_v59 = vpop.f32.mrb[27].mxu1  ;;  %v2608_v60 = vpop.f32.mrb[35].mxu0 }
 0x213   :  { %v3216_v62 = vpop.f32.mrb[28].mxu1  ;;  %v3218_v0 = vpop.f32.mrb[36].mxu0 }
 0x214   :  { %v2601_v1 = vpop.f32.mrb[29].mxu1  ;;  %v1330_v2 = vsel %vm1311_vm2, %v3218_v0, -inf  ;;  %v1321_v3 = vsel %vm1311_vm2, %v3216_v62, -inf  ;;  %v2619_v4 = vpop.f32.mrb[37].mxu0 }
 0x215   :  { %1331 = vmax.xlane.f32.xlu0 %v1330_v2  ;;  %1322 = vmax.xlane.f32.xlu1 %v1321_v3  ;;  %v828_v5 = vpop.f32.mrb[30].mxu1  ;;  %v948_v6 = vpop.f32.mrb[38].mxu0 }
 0x216   :  { %v2602_v8 = vpop.f32.mrb[31].mxu1  ;;  %v2620_v9 = vpop.f32.mrb[39].mxu0 }
 0x21b   :  { %v3224_v10 = vpop.f32.mrb[32].mxu1  ;;  %v3226_v63 = vpop.f32.mrb[40].mxu0 }
 0x21c   :  { %v2613_v52 = vpop.f32.mrb[33].mxu1  ;;  %v1336_v12 = vsel %vm1311_vm2, %v3226_v63, -inf  ;;  %v1327_v14 = vsel %vm1311_vm2, %v3224_v10, -inf  ;;  %v2631_v17 = vpop.f32.mrb[41].mxu0 }
 0x21d   :  { %1337 = vmax.xlane.f32.xlu0 %v1336_v12  ;;  %1328 = vmax.xlane.f32.xlu1 %v1327_v14  ;;  %v908_v18 = vpop.f32.mrb[34].mxu1  ;;  %v1028_v23 = vpop.f32.mrb[42].mxu0 }
 0x21e   :  { %v2614_v24 = vpop.f32.mrb[35].mxu1  ;;  %v2632_v40 = vpop.f32.mrb[43].mxu0 }
 0x223   :  { %v3232_v26 = vpop.f32.mrb[36].mxu1  ;;  %v3234_v27 = vpop.f32.mrb[44].mxu0 }
 0x224   :  { %v1342_v28 = vsel %vm1311_vm2, %v3234_v27, -inf  ;;  %v1333_v29 = vsel %vm1311_vm2, %v3232_v26, -inf  ;;  %v2625_v46 = vpop.f32.mrb[37].mxu1  ;;  %v2643_v7 = vpop.f32.mrb[45].mxu0 }
 0x225   :  { %1343 = vmax.xlane.f32.xlu0 %v1342_v28  ;;  %1334 = vmax.xlane.f32.xlu1 %v1333_v29  ;;  %v988_v19 = vpop.f32.mrb[38].mxu1  ;;  %v1108_v30 = vpop.f32.mrb[46].mxu0 }
 0x226   :  { %v2626_v31 = vpop.f32.mrb[39].mxu1  ;;  %v2644_v34 = vpop.f32.mrb[47].mxu0 }
 0x22b   :  { %v3240_v35 = vpop.f32.mrb[40].mxu1  ;;  %v3242_v13 = vpop.f32.mrb[48].mxu0 }
 0x22c   :  { %v1348_v36 = vsel %vm1311_vm2, %v3242_v13, -inf  ;;  %v1339_v39 = vsel %vm1311_vm2, %v3240_v35, -inf  ;;  %v2637_v41 = vpop.f32.mrb[41].mxu1  ;;  %v2655_v42 = vpop.f32.mrb[49].mxu0 }
 0x22d   :  { %1349 = vmax.xlane.f32.xlu0 %v1348_v36  ;;  %1340 = vmax.xlane.f32.xlu1 %v1339_v39  ;;  %v1068_v43 = vpop.f32.mrb[42].mxu1  ;;  %v1188_v48 = vpop.f32.mrb[50].mxu0 }
 0x22e   :  { %v2638_v50 = vpop.f32.mrb[43].mxu1  ;;  %v2656_v54 = vpop.f32.mrb[51].mxu0 }
 0x233   :  { %v3248_v57 = vpop.f32.mrb[44].mxu1  ;;  %v3250_v38 = vpop.f32.mrb[52].mxu0 }
 0x234   :  { %v1354_v58 = vsel %vm1311_vm2, %v3250_v38, -inf  ;;  %v1345_v59 = vsel %vm1311_vm2, %v3248_v57, -inf  ;;  %v2649_v60 = vpop.f32.mrb[45].mxu1  ;;  %v2667_v1 = vpop.f32.mrb[53].mxu0 }
 0x235   :  { %1355 = vmax.xlane.f32.xlu0 %v1354_v58  ;;  %1346 = vmax.xlane.f32.xlu1 %v1345_v59  ;;  %v1148_v2 = vpop.f32.mrb[46].mxu1  ;;  %v1268_v3 = vpop.f32.mrb[54].mxu0 }
 0x236   :  { %v2650_v4 = vpop.f32.mrb[47].mxu1  ;;  %v2668_v5 = vpop.f32.mrb[55].mxu0 }
 0x23b   :  { %v3256_v6 = vpop.f32.mrb[48].mxu1 }
 0x23c   :  { %v1351_v8 = vsel %vm1311_vm2, %v3256_v6, -inf  ;;  %v2661_v9 = vpop.f32.mrb[49].mxu1 }
 0x23d   :  { %1352 = vmax.xlane.f32.xlu1 %v1351_v8  ;;  %v1228_v52 = vpop.f32.mrb[50].mxu1 }
 0x23e   :  { %v2662_v12 = vpop.f32.mrb[51].mxu1 }
 0x243   :  { %v3260_v14 = vpop.f32.mrb[52].mxu1 }
 0x244   :  { %v1357_v17 = vsel %vm1311_vm2, %v3260_v14, -inf  ;;  %v2673_v18 = vpop.f32.mrb[53].mxu1 }
 0x245   :  { %1358 = vmax.xlane.f32.xlu1 %v1357_v17  ;;  %v1308_v23 = vpop.f32.mrb[54].mxu1 }
 0x246   :  { %v2674_v24 = vpop.f32.mrb[55].mxu1 }
 0x28a   :  { %v1314_v40 = vpop.xlane.xlu0 %1313 }
 0x28b   :  { %v1360_v28 = vsub.f32 %v3200_v32, %v1314_v40 }
 0x28d   :  { %v1376_v29 = vmul.f32 1.442695, %v1360_v28 }
 0x28f   :  { %2823 = vpow2.f32 %v1376_v29 }
 0x292   :  { %v1317_v46 = vpop.xlane.xlu0 %1316 }
 0x293   :  { %v1361_v7 = vsub.f32 %v3204_v37, %v1317_v46 }
 0x295   :  { %v1378_v19 = vmul.f32 1.442695, %v1361_v7 }
 0x297   :  { %2825 = vpow2.f32 %v1378_v19 }
 0x299   :  { %v2824_v30 = vpop.eup %2823 }
 0x29a   :  { %v1326_v31 = vpop.xlane.xlu0 %1325  ;;  %v1320_v34 = vpop.xlane.xlu1 %1319  ;;  %v1408_v36 = vsel %vm1311_vm2, %v2824_v30, 0.0  ;;  %v1520_v39 = vpack.c.bf16 %v2824_v30, %v2824_v30 }
 0x29b   :  { %v1364_v41 = vsub.f32 %v3210_v21, %v1326_v31  ;;  %v1362_v42 = vsub.f32 %v3208_v45, %v1320_v34  ;;  %1409 = vadd.xlane.f32.xlu0 %v1408_v36 }
 0x29c   :  { %2678 = vmatmul.mubr.msk.bf16.vlgmr.msra.gmra.mrb[56].mxu0 %vm1311_vm2, %v1520_v39 }
 0x29d   :  { %v1380_v32 = vmul.f32 1.442695, %v1362_v42  ;;  %2688 = vmatpush3.bf16.msra.mxu0 %v3066_v16  ;;  %2689 = vmatprep.mubr.msk.bf16.mxu0 %vm2967_vm0, %v2966_v33  ;;  %v1384_v37 = vmul.f32 1.442695, %v1364_v41 }
 0x29e   :  { %2699 = vmatprep.subr.bf16.mxu0 %v2966_v33 }
 0x29f   :  { %2827 = vpow2.f32 %v1380_v32 }
 0x2a0   :  { %2829 = vpow2.f32 %v1384_v37 }
 0x2a1   :  { %v2826_v43 = vpop.eup %2825 }
 0x2a2   :  { %v1332_v48 = vpop.xlane.xlu0 %1331  ;;  %v1323_v50 = vpop.xlane.xlu1 %1322  ;;  %v1411_v21 = vsel %vm1311_vm2, %v2826_v43, 0.0  ;;  %v1521_v45 = vpack.c.bf16 %v2826_v43, %v2826_v43 }
 0x2a3   :  { %v1366_v54 = vsub.f32 %v3218_v0, %v1332_v48  ;;  %v1363_v58 = vsub.f32 %v3216_v62, %v1323_v50  ;;  %1412 = vadd.xlane.f32.xlu1 %v1411_v21 }
 0x2a4   :  { %2684 = vmatmul.mubr.msk.bf16.vlgmr.msra.gmra.mrb[56].mxu1 %vm1311_vm2, %v1521_v45 }
 0x2a5   :  { %v1388_v16 = vmul.f32 1.442695, %v1366_v54  ;;  %v1382_v59 = vmul.f32 1.442695, %v1363_v58  ;;  %2694 = vmatpush3.bf16.msra.mxu1 %v3072_v22  ;;  %2695 = vmatprep.mubr.msk.bf16.mxu1 %vm2967_vm0, %v2966_v33 }
 0x2a6   :  { %2705 = vmatprep.subr.bf16.mxu1 %v2966_v33 }
 0x2a7   :  { %2831 = vpow2.f32 %v1388_v16 }
 0x2a8   :  { %2833 = vpow2.f32 %v1382_v59 }
 0x2a9   :  { %v2828_v60 = vpop.eup %2827 }
 0x2aa   :  { %v1338_v1 = vpop.xlane.xlu0 %1337  ;;  %v1329_v2 = vpop.xlane.xlu1 %1328  ;;  %v1414_v3 = vsel %vm1311_vm2, %v2828_v60, 0.0  ;;  %v1522_v4 = vpack.c.bf16 %v2828_v60, %v2828_v60 }
 0x2ab   :  { %v1368_v0 = vsub.f32 %v3226_v63, %v1338_v1  ;;  %v1365_v62 = vsub.f32 %v3224_v10, %v1329_v2  ;;  %v2830_v5 = vpop.eup %2829  ;;  %1415 = vadd.xlane.f32.xlu0 %v1414_v3 }
 0x2ac   :  { %2690 = vmatmul.mubr.msk.bf16.vlgmr.msra.gmra.mrb[60].mxu0 %vm1311_vm2, %v1522_v4  ;;  %v1420_v9 = vsel %vm1311_vm2, %v2830_v5, 0.0  ;;  %v1524_v18 = vpack.c.bf16 %v2830_v5, %v2830_v5 }
 0x2ad   :  { %v1392_v22 = vmul.f32 1.442695, %v1368_v0  ;;  %v1386_v8 = vmul.f32 1.442695, %v1365_v62  ;;  %2700 = vmatpush3.bf16.msra.mxu0 %v3091_v49  ;;  %2701 = vmatprep.mubr.msk.bf16.mxu0 %vm2967_vm0, %v2966_v33 }
 0x2ae   :  { %2711 = vmatprep.subr.bf16.mxu0 %v2966_v33 }
 0x2af   :  { %2835 = vpow2.f32 %v1392_v22  ;;  %1421 = vadd.xlane.f32.xlu0 %v1420_v9 }
 0x2b0   :  { %2837 = vpow2.f32 %v1386_v8 }
 0x2b1   :  { %v2832_v10 = vpop.eup %2831 }
 0x2b2   :  { %v2834_v63 = vpop.eup %2833  ;;  %v1344_v52 = vpop.xlane.xlu0 %1343  ;;  %v1426_v17 = vsel %vm1311_vm2, %v2832_v10, 0.0  ;;  %v1526_v19 = vpack.c.bf16 %v2832_v10, %v2832_v10 }
 0x2b3   :  { %v1335_v12 = vpop.xlane.xlu1 %1334  ;;  %v1370_v23 = vsub.f32 %v3234_v27, %v1344_v52  ;;  %v1417_v24 = vsel %vm1311_vm2, %v2834_v63, 0.0  ;;  %v1523_v40 = vpack.c.bf16 %v2834_v63, %v2834_v63  ;;  %1427 = vadd.xlane.f32.xlu0 %v1426_v17 }
 0x2b4   :  { %v1367_v49 = vsub.f32 %v3232_v26, %v1335_v12  ;;  %1418 = vadd.xlane.f32.xlu1 %v1417_v24  ;;  %2702 = vmatmul.mubr.msk.bf16.vlgmr.msra.gmra.mrb[64].mxu0 %vm1311_vm2, %v1524_v18 }
 0x2b5   :  { %v1396_v28 = vmul.f32 1.442695, %v1370_v23  ;;  %2696 = vmatmul.mubr.msk.bf16.vlgmr.msra.gmra.mrb[60].mxu1 %vm1311_vm2, %v1523_v40  ;;  %2712 = vmatpush3.bf16.msra.mxu0 %v3088_v44 }
 0x2b6   :  { %v1390_v29 = vmul.f32 1.442695, %v1367_v49  ;;  %2706 = vmatpush3.bf16.msra.mxu1 %v3100_v56  ;;  %2713 = vmatprep.mubr.msk.bf16.mxu0 %vm2967_vm0, %v2966_v33 }
 0x2b7   :  { %2839 = vpow2.f32 %v1396_v28  ;;  %2723 = vmatprep.subr.bf16.mxu0 %v2966_v33  ;;  %2707 = vmatprep.mubr.msk.bf16.mxu1 %vm2967_vm0, %v2966_v33 }
 0x2b8   :  { %2841 = vpow2.f32 %v1390_v29  ;;  %2717 = vmatprep.subr.bf16.mxu1 %v2966_v33 }
 0x2b9   :  { %v2836_v26 = vpop.eup %2835 }
 0x2ba   :  { %v2838_v27 = vpop.eup %2837  ;;  %v1350_v46 = vpop.xlane.xlu0 %1349  ;;  %v1432_v56 = vsel %vm1311_vm2, %v2836_v26, 0.0  ;;  %v1528_v32 = vpack.c.bf16 %v2836_v26, %v2836_v26 }
 0x2bb   :  { %v1341_v7 = vpop.xlane.xlu1 %1340  ;;  %v1372_v44 = vsub.f32 %v3242_v13, %v1350_v46  ;;  %1433 = vadd.xlane.f32.xlu0 %v1432_v56  ;;  %v1423_v31 = vsel %vm1311_vm2, %v2838_v27, 0.0  ;;  %v1525_v34 = vpack.c.bf16 %v2838_v27, %v2838_v27 }
 0x2bc   :  { %v1369_v30 = vsub.f32 %v3240_v35, %v1341_v7  ;;  %1424 = vadd.xlane.f32.xlu1 %v1423_v31  ;;  %2714 = vmatmul.mubr.msk.bf16.vlgmr.msra.gmra.mrb[68].mxu0 %vm1311_vm2, %v1526_v19 }
 0x2bd   :  { %v1400_v36 = vmul.f32 1.442695, %v1372_v44  ;;  %2708 = vmatmul.mubr.msk.bf16.vlgmr.msra.gmra.mrb[64].mxu1 %vm1311_vm2, %v1525_v34  ;;  %2724 = vmatpush3.bf16.msra.mxu0 %v3120_v15 }
 0x2be   :  { %v1394_v39 = vmul.f32 1.442695, %v1369_v30  ;;  %2718 = vmatpush3.bf16.msra.mxu1 %v3097_v53  ;;  %2725 = vmatprep.mubr.msk.bf16.mxu0 %vm2967_vm0, %v2966_v33 }
 0x2bf   :  { %2843 = vpow2.f32 %v1400_v36  ;;  %2735 = vmatprep.subr.bf16.mxu0 %v2966_v33  ;;  %2719 = vmatprep.mubr.msk.bf16.mxu1 %vm2967_vm0, %v2966_v33 }
 0x2c0   :  { %2845 = vpow2.f32 %v1394_v39  ;;  %2729 = vmatprep.subr.bf16.mxu1 %v2966_v33 }
 0x2c1   :  { %v2840_v35 = vpop.eup %2839 }
 0x2c2   :  { %v2842_v13 = vpop.eup %2841  ;;  %v1356_v41 = vpop.xlane.xlu0 %1355  ;;  %v1438_v53 = vsel %vm1311_vm2, %v2840_v35, 0.0  ;;  %v1530_v16 = vpack.c.bf16 %v2840_v35, %v2840_v35 }
 0x2c3   :  { %v1347_v42 = vpop.xlane.xlu1 %1346  ;;  %v1374_v15 = vsub.f32 %v3250_v38, %v1356_v41  ;;  %1439 = vadd.xlane.f32.xlu0 %v1438_v53  ;;  %v1429_v43 = vsel %vm1311_vm2, %v2842_v13, 0.0  ;;  %v1527_v48 = vpack.c.bf16 %v2842_v13, %v2842_v13 }
 0x2c4   :  { %v1371_v37 = vsub.f32 %v3248_v57, %v1347_v42  ;;  %1430 = vadd.xlane.f32.xlu1 %v1429_v43  ;;  %2726 = vmatmul.mubr.msk.bf16.vlgmr.msra.gmra.mrb[72].mxu0 %vm1311_vm2, %v1528_v32 }
 0x2c5   :  { %v1404_v50 = vmul.f32 1.442695, %v1374_v15  ;;  %2720 = vmatmul.mubr.msk.bf16.vlgmr.msra.gmra.mrb[68].mxu1 %vm1311_vm2, %v1527_v48  ;;  %2736 = vmatpush3.bf16.msra.mxu0 %v3117_v11 }
 0x2c6   :  { %v1398_v21 = vmul.f32 1.442695, %v1371_v37  ;;  %2730 = vmatpush3.bf16.msra.mxu1 %v3129_v25  ;;  %2737 = vmatprep.mubr.msk.bf16.mxu0 %vm2967_vm0, %v2966_v33 }
 0x2c7   :  { %2847 = vpow2.f32 %v1404_v50  ;;  %2747 = vmatprep.subr.bf16.mxu0 %v2966_v33  ;;  %2731 = vmatprep.mubr.msk.bf16.mxu1 %vm2967_vm0, %v2966_v33 }
 0x2c8   :  { %2849 = vpow2.f32 %v1398_v21  ;;  %2741 = vmatprep.subr.bf16.mxu1 %v2966_v33 }
 0x2c9   :  { %v2844_v57 = vpop.eup %2843 }
 0x2ca   :  { %v2846_v38 = vpop.eup %2845  ;;  %v1353_v45 = vpop.xlane.xlu1 %1352  ;;  %v1444_v54 = vsel %vm1311_vm2, %v2844_v57, 0.0  ;;  %v1532_v62 = vpack.c.bf16 %v2844_v57, %v2844_v57 }
 0x2cb   :  { %v1373_v25 = vsub.f32 %v3256_v6, %v1353_v45  ;;  %1445 = vadd.xlane.f32.xlu0 %v1444_v54  ;;  %v1435_v11 = vsel %vm1311_vm2, %v2846_v38, 0.0  ;;  %v1529_v58 = vpack.c.bf16 %v2846_v38, %v2846_v38 }
 0x2cc   :  { %1436 = vadd.xlane.f32.xlu1 %v1435_v11  ;;  %2738 = vmatmul.mubr.msk.bf16.vlgmr.msra.gmra.mrb[76].mxu0 %vm1311_vm2, %v1530_v16 }
 0x2cd   :  { %v1402_v59 = vmul.f32 1.442695, %v1373_v25  ;;  %2732 = vmatmul.mubr.msk.bf16.vlgmr.msra.gmra.mrb[72].mxu1 %vm1311_vm2, %v1529_v58  ;;  %2748 = vmatpush3.bf16.msra.mxu0 %v3149_v51 }
 0x2ce   :  { %2742 = vmatpush3.bf16.msra.mxu1 %v3126_v20  ;;  %2749 = vmatprep.mubr.msk.bf16.mxu0 %vm2967_vm0, %v2966_v33 }
 0x2cf   :  { %2851 = vpow2.f32 %v1402_v59  ;;  %2759 = vmatprep.subr.bf16.mxu0 %v2966_v33  ;;  %2743 = vmatprep.mubr.msk.bf16.mxu1 %vm2967_vm0, %v2966_v33 }
 0x2d0   :  { %2753 = vmatprep.subr.bf16.mxu1 %v2966_v33 }
 0x2d1   :  { %v2848_v6 = vpop.eup %2847 }
 0x2d2   :  { %v2850_v60 = vpop.eup %2849  ;;  %v1359_v1 = vpop.xlane.xlu1 %1358  ;;  %v1450_v2 = vsel %vm1311_vm2, %v2848_v6, 0.0  ;;  %v1534_v22 = vpack.c.bf16 %v2848_v6, %v2848_v6 }
 0x2d3   :  { %v1375_v20 = vsub.f32 %v3260_v14, %v1359_v1  ;;  %1451 = vadd.xlane.f32.xlu0 %v1450_v2  ;;  %v1441_v51 = vsel %vm1311_vm2, %v2850_v60, 0.0  ;;  %v1531_v0 = vpack.c.bf16 %v2850_v60, %v2850_v60 }
 0x2d4   :  { %1442 = vadd.xlane.f32.xlu1 %v1441_v51  ;;  %2750 = vmatmul.mubr.msk.bf16.vlgmr.msra.gmra.mrb[80].mxu0 %vm1311_vm2, %v1532_v62 }
 0x2d5   :  { %v1406_v3 = vmul.f32 1.442695, %v1375_v20  ;;  %2744 = vmatmul.mubr.msk.bf16.vlgmr.msra.gmra.mrb[76].mxu1 %vm1311_vm2, %v1531_v0  ;;  %2760 = vmatpush3.bf16.msra.mxu0 %v3146_v47 }
 0x2d6   :  { %2754 = vmatpush3.bf16.msra.mxu1 %v3157_v61  ;;  %2755 = vmatprep.mubr.msk.bf16.mxu1 %vm2967_vm0, %v2966_v33 }
 0x2d7   :  { %2853 = vpow2.f32 %v1406_v3  ;;  %2761 = vmatprep.mubr.msk.bf16.mxu0 %vm2967_vm0, %v2966_v33  ;;  %2765 = vmatprep.subr.bf16.mxu1 %v2966_v33 }
 0x2d9   :  { %v2852_v14 = vpop.eup %2851 }
 0x2da   :  { %v1447_v4 = vsel %vm1311_vm2, %v2852_v14, 0.0  ;;  %v1533_v5 = vpack.c.bf16 %v2852_v14, %v2852_v14 }
 0x2db   :  { %1448 = vadd.xlane.f32.xlu1 %v1447_v4 }
 0x2dc   :  { %2762 = vmatmul.mubr.msk.bf16.vlgmr.msra.gmra.mrb[84].mxu0 %vm1311_vm2, %v1534_v22 }
 0x2dd   :  { %2756 = vmatmul.mubr.msk.bf16.vlgmr.msra.gmra.mrb[80].mxu1 %vm1311_vm2, %v1533_v5 }
 0x2de   :  { %2766 = vmatpush3.bf16.msra.mxu1 %v3153_v55  ;;  %2767 = vmatprep.mubr.msk.bf16.mxu1 %vm2967_vm0, %v2966_v33 }
 0x2e1   :  { %v2854_v47 = vpop.eup %2853 }
 0x2e2   :  { %v1453_v61 = vsel %vm1311_vm2, %v2854_v47, 0.0  ;;  %v1535_v8 = vpack.c.bf16 %v2854_v47, %v2854_v47 }
 0x2e3   :  { %1454 = vadd.xlane.f32.xlu1 %v1453_v61 }
 0x2e5   :  { %2768 = vmatmul.mubr.msk.bf16.vlgmr.msra.gmra.mrb[84].mxu1 %vm1311_vm2, %v1535_v8 }
 0x328   :  { %v1410_v9 = vpop.xlane.xlu0 %1409 }
 0x329   :  { %2855 = vrcp.f32 %v1410_v9 }
 0x330   :  { %v1413_v10 = vpop.xlane.xlu1 %1412 }
 0x331   :  { %2857 = vrcp.f32 %v1413_v10 }
 0x333   :  { %v2856_v63 = vpop.eup %2855 }
 0x334   :  { %v1472_v52 = vmul.f32 %v2856_v63, %v1410_v9 }
 0x336   :  { %v1488_v17 = vsub.f32 2.0, %v1472_v52 }
 0x338   :  { %v1416_v12 = vpop.xlane.xlu0 %1415  ;;  %v1504_v33 = vmul.f32 %v2856_v63, %v1488_v17 }
 0x339   :  { %2859 = vrcp.f32 %v1416_v12 }
 0x33b   :  { %v2858_v55 = vpop.eup %2857 }
 0x33c   :  { %v1473_v18 = vmul.f32 %v2858_v55, %v1413_v10  ;;  %v1422_v23 = vpop.xlane.xlu0 %1421 }
 0x33d   :  { %2861 = vrcp.f32 %v1422_v23 }
 0x33e   :  { %v1489_v26 = vsub.f32 2.0, %v1473_v18 }
 0x340   :  { %v1428_v7 = vpop.xlane.xlu0 %1427  ;;  %v1505_v56 = vmul.f32 %v2858_v55, %v1489_v26 }
 0x341   :  { %v1419_v49 = vpop.xlane.xlu1 %1418 }
 0x342   :  { %2863 = vrcp.f32 %v1419_v49 }
 0x343   :  { %v2860_v46 = vpop.eup %2859  ;;  %2865 = vrcp.f32 %v1428_v7 }
 0x344   :  { %v1474_v19 = vmul.f32 %v2860_v46, %v1416_v12 }
 0x346   :  { %v1490_v13 = vsub.f32 2.0, %v1474_v19 }
 0x347   :  { %v2862_v35 = vpop.eup %2861 }
 0x348   :  { %v1434_v42 = vpop.xlane.xlu0 %1433  ;;  %v1476_v53 = vmul.f32 %v2862_v35, %v1422_v23  ;;  %v1506_v37 = vmul.f32 %v2860_v46, %v1490_v13 }
 0x349   :  { %v1425_v44 = vpop.xlane.xlu1 %1424 }
 0x34a   :  { %2867 = vrcp.f32 %v1425_v44  ;;  %v1492_v38 = vsub.f32 2.0, %v1476_v53 }
 0x34b   :  { %2869 = vrcp.f32 %v1434_v42 }
 0x34c   :  { %v2864_v41 = vpop.eup %2863  ;;  %v1508_v60 = vmul.f32 %v2862_v35, %v1492_v38 }
 0x34d   :  { %v1475_v32 = vmul.f32 %v2864_v41, %v1419_v49  ;;  %v2866_v57 = vpop.eup %2865 }
 0x34e   :  { %v1478_v58 = vmul.f32 %v2866_v57, %v1428_v7 }
 0x34f   :  { %v1491_v45 = vsub.f32 2.0, %v1475_v32 }
 0x350   :  { %v1440_v11 = vpop.xlane.xlu0 %1439  ;;  %v1494_v5 = vsub.f32 2.0, %v1478_v58 }
 0x351   :  { %v1431_v15 = vpop.xlane.xlu1 %1430  ;;  %v1507_v6 = vmul.f32 %v2864_v41, %v1491_v45 }
 0x352   :  { %2871 = vrcp.f32 %v1431_v15  ;;  %v1510_v17 = vmul.f32 %v2866_v57, %v1494_v5 }
 0x353   :  { %2873 = vrcp.f32 %v1440_v11 }
 0x354   :  { %v2868_v25 = vpop.eup %2867 }
 0x355   :  { %v1477_v16 = vmul.f32 %v2868_v25, %v1425_v44  ;;  %v2870_v4 = vpop.eup %2869 }
 0x356   :  { %v1480_v10 = vmul.f32 %v2870_v4, %v1434_v42 }
 0x357   :  { %v1493_v22 = vsub.f32 2.0, %v1477_v16 }
 0x358   :  { %v1446_v9 = vpop.xlane.xlu0 %1445  ;;  %v1496_v26 = vsub.f32 2.0, %v1480_v10 }
 0x359   :  { %v1437_v59 = vpop.xlane.xlu1 %1436  ;;  %v1509_v12 = vmul.f32 %v2868_v25, %v1493_v22 }
 0x35a   :  { %2875 = vrcp.f32 %v1437_v59 }
 0x35b   :  { %2877 = vrcp.f32 %v1446_v9 }
 0x35c   :  { %v2872_v8 = vpop.eup %2871 }
 0x35d   :  { %v1479_v63 = vmul.f32 %v2872_v8, %v1431_v15 }
 0x360   :  { %v1452_v19 = vpop.xlane.xlu0 %1451 }
 0x361   :  { %v1443_v52 = vpop.xlane.xlu1 %1442 }
 0x362   :  { %2879 = vrcp.f32 %v1443_v52 }
 0x363   :  { %2881 = vrcp.f32 %v1452_v19 }
 0x36f   :  { %v1577_v24 = vpop.f32.mrb[56].mxu0 }
 0x370   :  { %v2273_v40 = vmul.f32 %v1577_v24, %v1504_v33  ;;  %v2679_v28 = vpop.f32.mrb[57].mxu0 }
 0x371   :  { %v1580_v29 = vpop.f32.mrb[58].mxu0 }
 0x372   :  { %2289 = vst [vmem:[#allocation7] sm:$0xff] %v2273_v40  ;;  %v2680_v27 = vpop.f32.mrb[59].mxu0  ;;  %v2874_v29 = vpop.eup %2873 }
 0x373   :  { %v1495_v27 = vsub.f32 2.0, %v1479_v63  ;;  %v1482_v44 = vmul.f32 %v2874_v29, %v1440_v11 }
 0x377   :  { %v1623_v30 = vpop.f32.mrb[56].mxu1 }
 0x378   :  { %v2274_v31 = vmul.f32 %v1623_v30, %v1505_v56  ;;  %v2685_v34 = vpop.f32.mrb[57].mxu1  ;;  %v2876_v56 = vpop.eup %2875 }
 0x379   :  { %v1626_v36 = vpop.f32.mrb[58].mxu1  ;;  %v1481_v30 = vmul.f32 %v2876_v56, %v1437_v59  ;;  %v1511_v34 = vmul.f32 %v2872_v8, %v1495_v27 }
 0x37a   :  { %2290 = vst [vmem:[#allocation7 + $0x8] sm:$0xff] %v2274_v31  ;;  %v2686_v39 = vpop.f32.mrb[59].mxu1  ;;  %v1449_v31 = vpop.xlane.xlu1 %1448  ;;  %v1512_v36 = vmul.f32 %v2870_v4, %v1496_v26 }
 0x37b   :  { %2883 = vrcp.f32 %v1449_v31 }
 0x37f   :  { %v1669_v43 = vpop.f32.mrb[60].mxu0 }
 0x380   :  { %v2275_v48 = vmul.f32 %v1669_v43, %v1506_v37  ;;  %v2691_v50 = vpop.f32.mrb[61].mxu0  ;;  %v2878_v37 = vpop.eup %2877  ;;  %v1498_v43 = vsub.f32 2.0, %v1482_v44 }
 0x381   :  { %v1672_v21 = vpop.f32.mrb[62].mxu0  ;;  %v2880_v57 = vpop.eup %2879  ;;  %v1484_v38 = vmul.f32 %v2878_v37, %v1446_v9 }
 0x382   :  { %2291 = vst [vmem:[#allocation7 + $0x10] sm:$0xff] %v2275_v48  ;;  %v2692_v54 = vpop.f32.mrb[63].mxu0  ;;  %v1497_v48 = vsub.f32 2.0, %v1481_v30  ;;  %v1483_v45 = vmul.f32 %v2880_v57, %v1443_v52  ;;  %v1514_v11 = vmul.f32 %v2874_v29, %v1498_v43 }
 0x383   :  { %v1455_v54 = vpop.xlane.xlu1 %1454 }
 0x384   :  { %v1513_v25 = vmul.f32 %v2876_v56, %v1497_v48  ;;  %2885 = vrcp.f32 %v1455_v54 }
 0x387   :  { %v1761_v2 = vpop.f32.mrb[64].mxu0 }
 0x388   :  { %v1715_v1 = vpop.f32.mrb[60].mxu1  ;;  %v2277_v51 = vmul.f32 %v1761_v2, %v1508_v60  ;;  %v2703_v62 = vpop.f32.mrb[65].mxu0 }
 0x389   :  { %v2276_v20 = vmul.f32 %v1715_v1, %v1507_v6  ;;  %v2697_v0 = vpop.f32.mrb[61].mxu1  ;;  %v1764_v14 = vpop.f32.mrb[66].mxu0  ;;  %v1499_v62 = vsub.f32 2.0, %v1483_v45 }
 0x38a   :  { %v1718_v3 = vpop.f32.mrb[62].mxu1  ;;  %2293 = vst [vmem:[#allocation7 + $0x20] sm:$0xff] %v2277_v51  ;;  %v2704_v61 = vpop.f32.mrb[67].mxu0  ;;  %v1500_v0 = vsub.f32 2.0, %v1484_v38 }
 0x38b   :  { %2292 = vst [vmem:[#allocation7 + $0x18] sm:$0xff] %v2276_v20  ;;  %v2698_v47 = vpop.f32.mrb[63].mxu1  ;;  %v2882_v51 = vpop.eup %2881 }
 0x38c   :  { %v2884_v4 = vpop.eup %2883  ;;  %v1486_v5 = vmul.f32 %v2882_v51, %v1452_v19  ;;  %v1515_v47 = vmul.f32 %v2880_v57, %v1499_v62  ;;  %v1516_v61 = vmul.f32 %v2878_v37, %v1500_v0 }
 0x38d   :  { %v1485_v22 = vmul.f32 %v2884_v4, %v1449_v31 }
 0x38f   :  { %v1853_v18 = vpop.f32.mrb[68].mxu0 }
 0x390   :  { %v1807_v55 = vpop.f32.mrb[64].mxu1  ;;  %v2279_v33 = vmul.f32 %v1853_v18, %v1510_v17  ;;  %v2715_v24 = vpop.f32.mrb[69].mxu0  ;;  %v1502_v18 = vsub.f32 2.0, %v1486_v5 }
 0x391   :  { %v2278_v23 = vmul.f32 %v1807_v55, %v1509_v12  ;;  %v2709_v49 = vpop.f32.mrb[65].mxu1  ;;  %v1856_v28 = vpop.f32.mrb[70].mxu0 }
 0x392   :  { %v1810_v40 = vpop.f32.mrb[66].mxu1  ;;  %2295 = vst [vmem:[#allocation7 + $0x30] sm:$0xff] %v2279_v33  ;;  %v2716_v7 = vpop.f32.mrb[71].mxu0  ;;  %v1518_v29 = vmul.f32 %v2882_v51, %v1502_v18 }
 0x393   :  { %2294 = vst [vmem:[#allocation7 + $0x28] sm:$0xff] %v2278_v23  ;;  %v2710_v46 = vpop.f32.mrb[67].mxu1  ;;  %v1501_v23 = vsub.f32 2.0, %v1485_v22  ;;  %v2886_v24 = vpop.eup %2885 }
 0x394   :  { %v1487_v40 = vmul.f32 %v2886_v24, %v1455_v54 }
 0x395   :  { %v1517_v28 = vmul.f32 %v2884_v4, %v1501_v23 }
 0x396   :  { %v1503_v31 = vsub.f32 2.0, %v1487_v40 }
 0x397   :  { %v1945_v35 = vpop.f32.mrb[72].mxu0 }
 0x398   :  { %v1899_v39 = vpop.f32.mrb[68].mxu1  ;;  %v2281_v41 = vmul.f32 %v1945_v35, %v1512_v36  ;;  %v2727_v53 = vpop.f32.mrb[73].mxu0 }
 0x399   :  { %v2280_v13 = vmul.f32 %v1899_v39, %v1511_v34  ;;  %v2721_v42 = vpop.f32.mrb[69].mxu1  ;;  %v1948_v15 = vpop.f32.mrb[74].mxu0  ;;  %v1519_v39 = vmul.f32 %v2886_v24, %v1503_v31 }
 0x39a   :  { %v1902_v32 = vpop.f32.mrb[70].mxu1  ;;  %2297 = vst [vmem:[#allocation7 + $0x40] sm:$0xff] %v2281_v41  ;;  %v2728_v21 = vpop.f32.mrb[75].mxu0 }
 0x39b   :  { %2296 = vst [vmem:[#allocation7 + $0x38] sm:$0xff] %v2280_v13  ;;  %v2722_v50 = vpop.f32.mrb[71].mxu1 }
 0x39f   :  { %v2037_v16 = vpop.f32.mrb[76].mxu0 }
 0x3a0   :  { %v1991_v58 = vpop.f32.mrb[72].mxu1  ;;  %v2283_v6 = vmul.f32 %v2037_v16, %v1514_v11  ;;  %v2739_v1 = vpop.f32.mrb[77].mxu0 }
 0x3a1   :  { %v2282_v59 = vmul.f32 %v1991_v58, %v1513_v25  ;;  %v2733_v60 = vpop.f32.mrb[73].mxu1  ;;  %v2040_v20 = vpop.f32.mrb[78].mxu0 }
 0x3a2   :  { %v1994_v2 = vpop.f32.mrb[74].mxu1  ;;  %2299 = vst [vmem:[#allocation7 + $0x50] sm:$0xff] %v2283_v6  ;;  %v2740_v14 = vpop.f32.mrb[79].mxu0 }
 0x3a3   :  { %2298 = vst [vmem:[#allocation7 + $0x48] sm:$0xff] %v2282_v59  ;;  %v2734_v3 = vpop.f32.mrb[75].mxu1 }
 0x3a7   :  { %v2129_v9 = vpop.f32.mrb[80].mxu0 }
 0x3a8   :  { %v2083_v8 = vpop.f32.mrb[76].mxu1  ;;  %v2285_v63 = vmul.f32 %v2129_v9, %v1516_v61  ;;  %v2751_v12 = vpop.f32.mrb[81].mxu0 }
 0x3a9   :  { %v2284_v10 = vmul.f32 %v2083_v8, %v1515_v47  ;;  %v2745_v52 = vpop.f32.mrb[77].mxu1  ;;  %v2132_v55 = vpop.f32.mrb[82].mxu0 }
 0x3aa   :  { %v2086_v17 = vpop.f32.mrb[78].mxu1  ;;  %2301 = vst [vmem:[#allocation7 + $0x60] sm:$0xff] %v2285_v63  ;;  %v2752_v49 = vpop.f32.mrb[83].mxu0 }
 0x3ab   :  { %2300 = vst [vmem:[#allocation7 + $0x58] sm:$0xff] %v2284_v10  ;;  %v2746_v33 = vpop.f32.mrb[79].mxu1 }
 0x3af   :  { %v2221_v27 = vpop.f32.mrb[84].mxu0 }
 0x3b0   :  { %v2175_v26 = vpop.f32.mrb[80].mxu1  ;;  %v2287_v7 = vmul.f32 %v2221_v27, %v1518_v29  ;;  %v2763_v19 = vpop.f32.mrb[85].mxu0 }
 0x3b1   :  { %v2286_v46 = vmul.f32 %v2175_v26, %v1517_v28  ;;  %v2757_v56 = vpop.f32.mrb[81].mxu1  ;;  %v2224_v30 = vpop.f32.mrb[86].mxu0 }
 0x3b2   :  { %v2178_v44 = vpop.f32.mrb[82].mxu1  ;;  %2303 = vst [vmem:[#allocation7 + $0x70] sm:$0xff] %v2287_v7  ;;  %v2764_v36 = vpop.f32.mrb[87].mxu0 }
 0x3b3   :  { %2302 = vst [vmem:[#allocation7 + $0x68] sm:$0xff] %v2286_v46  ;;  %v2758_v34 = vpop.f32.mrb[83].mxu1 }
 0x3b8   :  { %v2267_v35 = vpop.f32.mrb[84].mxu1 }
 0x3b9   :  { %v2288_v13 = vmul.f32 %v2267_v35, %v1519_v39  ;;  %v2769_v41 = vpop.f32.mrb[85].mxu1 }
 0x3ba   :  { %v2270_v42 = vpop.f32.mrb[86].mxu1 }
 0x3bb   :  { %2304 = vst [vmem:[#allocation7 + $0x78] sm:$0xff] %v2288_v13  ;;  %v2770_v53 = vpop.f32.mrb[87].mxu1 }
 0x3bc   :  { %2942 = shalt.err (!%p2939_p6)
}
 0x3bd   :  { %s2943_s17 = scalar_lea.hbm %s3381_s3, 2048 }
 0x3be   :  { %p2944_p7 = scmp.ne.s32.totalorder %s3381_s3, %s2943_s17  ;;  %p2947_p8 = scmp.lt.u32.totalorder %s2943_s17, %s3381_s3 }
 0x3c0   :  { %p2949_p9 = pnand %p2947_p8, %p2944_p7 }
 0x3c2   :  { %2952 = shalt.err (!%p2949_p9)
}
 0x3c3   :  { %s2969_s22 = smov 128   ;;  %s2970_s23 = smov 8  }
 0x3c4   :  { %2316 = dma.vmem_to_hbm [thread:$0]  %s2311_s13, 2048, %s3381_s3, [#allocation4], %s2969_s22, %s2969_s22, %s2970_s23  }
 0x3c5   :  { %2957 = dma.done.wait [#allocation4], 2048  }
 0x3c6   :  { %2958 = vsyncadd [#allocation4], 4294965248 }
 0x3c7   :  { %2320 = vsyncpa [#allocation3], 1 }
 0x3c8   :  { %2321 = vsyncpa [#allocation6], 1 }
 0x3c9   :  { %2322 = vsyncpa [#allocation4], 1 }

// kernel: tpu_custom_call.1
= control target key start
LH: loop header
LB: loop body
LE: loop exit
PB: predicated region body
PF: predicated region fallthrough
CT: control target
= control target key end

     0   :  { %8 = vsyncpa [#allocation3], 0  ;;  %s3378_s0 = inlined_call_operand.hbm [shape: bf16[16,8,128], index: 0, kind: input, shape index: {}]   ;;  %s3379_s1 = inlined_call_operand.hbm [shape: bf16[128,384], index: 1, kind: input, shape index: {}]   ;;  %s3380_s2 = inlined_call_operand.vmem [shape: f32[1,384], index: 2, kind: input, shape index: {}]   ;;  %s3381_s3 = inlined_call_operand.hbm [shape: f32[16,8,128], index: 3, kind: output, shape index: {}]  }
   0x1   :  { %9 = vsyncpa [#allocation6], 0 }
   0x2   :  { %10 = vsyncpa [#allocation4], 0  ;;  %s2959_s12 = smov [#allocation2]   ;;  %s2887_s16 = scalar_lea.hbm %s3378_s0, 1024 }
   0x3   :  { %s16_s13 = sshll.u32 %s2959_s12, 4  ;;  %p2888_p0 = scmp.ne.s32.totalorder %s3378_s0, %s2887_s16  ;;  %s17_s13 = int_to_ptr.vmem [resolvable:$true] %s16_s13 }
   0x4   :  { %p2891_p1 = scmp.lt.u32.totalorder %s2887_s16, %s3378_s0 }
   0x6   :  { %p2893_p2 = pnand %p2891_p1, %p2888_p0 }
   0x8   :  { %2896 = shalt.err (!%p2893_p2)
}
   0x9   :  { %s2897_s21 = scalar_lea.vmem %s17_s13, 1024  ;;  %p2902_p4 = scmp.lt.s32.totalorder %s17_s13, %s17_s13 }
   0xa   :  { %p2898_p3 = scmp.ne.s32.totalorder %s17_s13, %s2897_s21  ;;  %p2903_p5 = scmp.lt.s32.totalorder %s2897_s21, %s2897_s21 }
   0xc   :  { %p2904_p6 = por %p2903_p5, %p2902_p4 }
   0xe   :  { %p2905_p7 = pnand %p2904_p6, %p2898_p3 }
  0x10   :  { %2908 = shalt.err (!%p2905_p7)
}
  0x11   :  { %s2960_s22 = smov 64   ;;  %s2961_s23 = smov 4  }
  0x12   :  { %22 = dma.hbm_to_vmem [thread:$0]  %s3378_s0, 1024, %s17_s13, [#allocation3], %s2960_s22, %s2960_s22, %s2961_s23  }
  0x13   :  { %s2962_s26 = smov [#allocation5]   ;;  %s2909_s30 = scalar_lea.hbm %s3379_s1, 3072 }
  0x14   :  { %s28_s27 = sshll.u32 %s2962_s26, 4  ;;  %p2910_p8 = scmp.ne.s32.totalorder %s3379_s1, %s2909_s30  ;;  %s29_s27 = int_to_ptr.vmem [resolvable:$true] %s28_s27 }
  0x15   :  { %p2913_p9 = scmp.lt.u32.totalorder %s2909_s30, %s3379_s1 }
  0x17   :  { %p2915_p10 = pnand %p2913_p9, %p2910_p8 }
  0x19   :  { %2918 = shalt.err (!%p2915_p10)
}
  0x1a   :  { %s2919_s8 = scalar_lea.vmem %s29_s27, 3072  ;;  %p2924_p12 = scmp.lt.s32.totalorder %s29_s27, %s29_s27 }
  0x1b   :  { %p2920_p11 = scmp.ne.s32.totalorder %s29_s27, %s2919_s8  ;;  %p2925_p13 = scmp.lt.s32.totalorder %s2919_s8, %s2919_s8 }
  0x1d   :  { %p2926_p0 = por %p2925_p13, %p2924_p12 }
  0x1f   :  { %p2927_p1 = pnand %p2926_p0, %p2920_p11 }
  0x21   :  { %2930 = shalt.err (!%p2927_p1)
}
  0x22   :  { %s2963_s0 = smov 192   ;;  %s2964_s9 = smov 12  }
  0x23   :  { %34 = dma.hbm_to_vmem [thread:$0]  %s3379_s1, 3072, %s29_s27, [#allocation6], %s2963_s0, %s2963_s0, %s2964_s9  }
  0x24   :  { %2953 = dma.done.wait [#allocation3], 1024  }
  0x25   :  { %2954 = vsyncadd [#allocation3], 4294966272 }
  0x26   :  { %2955 = dma.done.wait [#allocation6], 3072  }
  0x27   :  { %2956 = vsyncadd [#allocation6], 4294964224  ;;  %v2965_v0 = vmov 0   ;;  %v2783_v1 = vld [vmem:[#allocation5 + $0x4] ss:$12 sps:$4 sm:$0xff]   ;;  %v2808_v24 = vld [vmem:[#allocation2 + $0x8] sm:$0xff]   ;;  %v94_v34 = vlaneseq }
  0x28   :  { %317 = vmatprep.mubr.bf16.mxu0 %v2965_v0  ;;  %v2785_v2 = vld [vmem:[#allocation5] ss:$12 sps:$4 sm:$0xff]   ;;  %285 = vmatprep.subr.bf16.mxu0 %v2783_v1  ;;  %v2786_v3 = vld [vmem:[#allocation5 + $0x1c] ss:$12 sps:$4 sm:$0xff]   ;;  %v2788_v4 = vld [vmem:[#allocation5 + $0x18] ss:$12 sps:$4 sm:$0xff]  }
  0x29   :  { %286 = vmatpush1.bf16.msra.mxu0 %v2785_v2  ;;  %v2789_v5 = vld [vmem:[#allocation5 + $0x34] ss:$12 sps:$4 sm:$0xff]   ;;  %v2791_v6 = vld [vmem:[#allocation5 + $0x30] ss:$12 sps:$4 sm:$0xff]   ;;  %v2792_v7 = vld [vmem:[#allocation5 + $0x4c] ss:$12 sps:$4 sm:$0xff]  }
  0x2a   :  { %287 = vmatprep.subr.bf16.mxu0 %v2786_v3  ;;  %v2794_v8 = vld [vmem:[#allocation5 + $0x48] ss:$12 sps:$4 sm:$0xff]   ;;  %v2807_v9 = vld [vmem:[#allocation2] sm:$0xff]   ;;  %v2803_v17 = vld [vmem:[#allocation5 + $0x90] ss:$12 sps:$4 sm:$0xff]   ;;  %v2966_v33 = vmov 0.0  }
  0x2b   :  { %v2795_v10 = vld [vmem:[#allocation5 + $0x64] ss:$12 sps:$4 sm:$0xff]   ;;  %2563 = vmatprep.mubr.bf16.mxu1 %v2807_v9  ;;  %v2797_v11 = vld [vmem:[#allocation5 + $0x60] ss:$12 sps:$4 sm:$0xff]   ;;  %v2798_v12 = vld [vmem:[#allocation5 + $0x7c] ss:$12 sps:$4 sm:$0xff]  }
  0x2c   :  { %v2800_v13 = vld [vmem:[#allocation5 + $0x78] ss:$12 sps:$4 sm:$0xff]   ;;  %v2801_v14 = vld [vmem:[#allocation5 + $0x94] ss:$12 sps:$4 sm:$0xff]   ;;  %v2818_v21 = vld [vmem:[#allocation5 + $0x50] ss:$12 sps:$4 sm:$0xff]  }
  0x2d   :  { %288 = vmatpush1.bf16.msra.mxu0 %v2788_v4  ;;  %v2815_v15 = vld [vmem:[#allocation5 + $0x8] ss:$12 sps:$4 sm:$0xff]   ;;  %v2816_v16 = vld [vmem:[#allocation5 + $0x20] ss:$12 sps:$4 sm:$0xff]   ;;  %v2817_v18 = vld [vmem:[#allocation5 + $0x38] ss:$12 sps:$4 sm:$0xff]  }
  0x2e   :  { %289 = vmatprep.subr.bf16.mxu0 %v2789_v5  ;;  %2547 = vmatprep.subr.bf16.mxu1 %v2815_v15  ;;  %v2804_v19 = vld [vmem:[#allocation5 + $0xac] ss:$12 sps:$4 sm:$0xff]   ;;  %v2806_v20 = vld [vmem:[#allocation5 + $0xa8] ss:$12 sps:$4 sm:$0xff]   ;;  %v2822_v26 = vld [vmem:[#allocation5 + $0xb0] ss:$12 sps:$4 sm:$0xff]  }
  0x2f   :  { %2548 = vmatpush3.bf16.msra.mxu1 %v2815_v15  ;;  %v2819_v22 = vld [vmem:[#allocation5 + $0x68] ss:$12 sps:$4 sm:$0xff]   ;;  %v2820_v23 = vld [vmem:[#allocation5 + $0x80] ss:$12 sps:$4 sm:$0xff]   ;;  %v2821_v25 = vld [vmem:[#allocation5 + $0x98] ss:$12 sps:$4 sm:$0xff]  }
  0x30   :  { %2549 = vmatprep.subr.bf16.mxu1 %v2816_v16  ;;  %v2809_v27 = vld [vmem:[#allocation2 + $0x10] sm:$0xff]   ;;  %v2810_v28 = vld [vmem:[#allocation2 + $0x18] sm:$0xff]   ;;  %v2811_v29 = vld [vmem:[#allocation2 + $0x20] sm:$0xff]   ;;  %vm2967_vm0 = vmmov 0   ;;  %v95_v35 = vshrl.u32 %v94_v34, 7  ;;  %vm1539_vm1 = vcmask 1043456  }
  0x31   :  { %290 = vmatpush1.bf16.msra.mxu0 %v2791_v6  ;;  %v2812_v30 = vld [vmem:[#allocation2 + $0x28] sm:$0xff]   ;;  %v2813_v31 = vld [vmem:[#allocation2 + $0x30] sm:$0xff]   ;;  %v2814_v32 = vld [vmem:[#allocation2 + $0x38] sm:$0xff]   ;;  %vm1311_vm2 = vcmask 64512  }
  0x32   :  { %291 = vmatprep.subr.bf16.mxu0 %v2792_v7  ;;  %v104_v36 = vsub.s32 2, %v95_v35  ;;  %v92_v37 = vld [vmem:[%s3380_s2] sm:$0x7]  ;;  %v100_v39 = vsub.s32 1, %v95_v35  ;;  %v96_v41 = vsub.s32 0, %v95_v35  ;;  %s2968_s2 = smov [#allocation7]  }
  0x33   :  { %2550 = vmatpush3.bf16.msra.mxu1 %v2816_v16  ;;  %s2310_s13 = sshll.u32 %s2968_s2, 4  ;;  %s2311_s13 = int_to_ptr.vmem [resolvable:$true] %s2310_s13 }
  0x34   :  { %2551 = vmatprep.subr.bf16.mxu1 %v2817_v18  ;;  %v3032_v38 = vrot.slane %v92_v37, %v104_v36  ;;  %v3034_v40 = vrot.slane %v92_v37, %v100_v39  ;;  %v3037_v46 = vrot.slane %v92_v37, %v96_v41  ;;  %s2931_s14 = scalar_lea.vmem %s2311_s13, 2048  ;;  %p2936_p3 = scmp.lt.s32.totalorder %s2311_s13, %s2311_s13 }
  0x35   :  { %292 = vmatpush1.bf16.msra.mxu0 %v2794_v8  ;;  %p2932_p2 = scmp.ne.s32.totalorder %s2311_s13, %s2931_s14  ;;  %p2937_p4 = scmp.lt.s32.totalorder %s2931_s14, %s2931_s14 }
  0x36   :  { %293 = vmatprep.subr.bf16.mxu0 %v2795_v10 }
  0x37   :  { %2552 = vmatpush3.bf16.msra.mxu1 %v2817_v18  ;;  %p2938_p5 = por %p2937_p4, %p2936_p3 }
  0x38   :  { %2553 = vmatprep.subr.bf16.mxu1 %v2818_v21 }
  0x39   :  { %294 = vmatpush1.bf16.msra.mxu0 %v2797_v11  ;;  %p2939_p6 = pnand %p2938_p5, %p2932_p2 }
  0x3a   :  { %295 = vmatprep.subr.bf16.mxu0 %v2798_v12 }
  0x3b   :  { %2554 = vmatpush3.bf16.msra.mxu1 %v2818_v21 }
  0x3c   :  { %2555 = vmatprep.subr.bf16.mxu1 %v2819_v22 }
  0x3d   :  { %296 = vmatpush1.bf16.msra.mxu0 %v2800_v13 }
  0x3e   :  { %297 = vmatprep.subr.bf16.mxu0 %v2801_v14 }
  0x3f   :  { %2556 = vmatpush3.bf16.msra.mxu1 %v2819_v22 }
  0x40   :  { %2557 = vmatprep.subr.bf16.mxu1 %v2820_v23 }
  0x41   :  { %298 = vmatpush1.bf16.msra.mxu0 %v2803_v17 }
  0x42   :  { %299 = vmatprep.subr.bf16.mxu0 %v2804_v19 }
  0x43   :  { %2558 = vmatpush3.bf16.msra.mxu1 %v2820_v23 }
  0x44   :  { %2559 = vmatprep.subr.bf16.mxu1 %v2821_v25 }
  0x45   :  { %300 = vmatpush1.bf16.msra.mxu0 %v2806_v20 }
  0x46   :  { %2603 = vmatprep.subr.bf16.mxu0 %v2966_v33 }
  0x47   :  { %2560 = vmatpush3.bf16.msra.mxu1 %v2821_v25 }
  0x48   :  { %318 = vmatmul.mubr.bf16.vlgmr.msra.gmra.mrb[0].mxu0 %v2807_v9  ;;  %2561 = vmatprep.subr.bf16.mxu1 %v2822_v26 }
  0x49   :  { %327 = vmatprep.mubr.bf16.mxu0 %v2965_v0 }
  0x4b   :  { %2562 = vmatpush3.bf16.msra.mxu1 %v2822_v26 }
  0x4c   :  { %2579 = vmatprep.subr.bf16.mxu1 %v2966_v33 }
  0x4e   :  { %2564 = vmatmul.mubr.bf16.vlgmr.msra.gmra.mrb[0].mxu1 %v2808_v24 }
  0x4f   :  { %2567 = vmatprep.mubr.bf16.mxu1 %v2809_v27 }
  0x50   :  { %328 = vmatmul.mubr.bf16.gmra.mrb[4].mxu0 %v2808_v24 }
  0x51   :  { %337 = vmatprep.mubr.bf16.mxu0 %v2965_v0 }
  0x56   :  { %2568 = vmatmul.mubr.bf16.gmra.mrb[4].mxu1 %v2810_v28 }
  0x57   :  { %2571 = vmatprep.mubr.bf16.mxu1 %v2811_v29 }
  0x58   :  { %338 = vmatmul.mubr.bf16.gmra.mrb[8].mxu0 %v2809_v27 }
  0x59   :  { %347 = vmatprep.mubr.bf16.mxu0 %v2965_v0 }
  0x5e   :  { %2572 = vmatmul.mubr.bf16.gmra.mrb[8].mxu1 %v2812_v30 }
  0x5f   :  { %2575 = vmatprep.mubr.bf16.mxu1 %v2813_v31 }
  0x60   :  { %348 = vmatmul.mubr.bf16.gmra.mrb[12].mxu0 %v2810_v28 }
  0x61   :  { %357 = vmatprep.mubr.bf16.mxu0 %v2965_v0 }
  0x66   :  { %2576 = vmatmul.mubr.bf16.gmra.mrb[12].mxu1 %v2814_v32 }
  0x67   :  { %2581 = vmatprep.mubr.msk.bf16.mxu1 %vm2967_vm0, %v2966_v33 }
  0x68   :  { %358 = vmatmul.mubr.bf16.gmra.mrb[16].mxu0 %v2811_v29 }
  0x69   :  { %367 = vmatprep.mubr.bf16.mxu0 %v2965_v0 }
  0x70   :  { %368 = vmatmul.mubr.bf16.gmra.mrb[20].mxu0 %v2812_v30 }
  0x71   :  { %377 = vmatprep.mubr.bf16.mxu0 %v2965_v0 }
  0x78   :  { %378 = vmatmul.mubr.bf16.gmra.mrb[24].mxu0 %v2813_v31 }
  0x79   :  { %387 = vmatprep.mubr.bf16.mxu0 %v2965_v0 }
  0x80   :  { %388 = vmatmul.mubr.bf16.gmra.mrb[28].mxu0 %v2814_v32 }
  0x81   :  { %2605 = vmatprep.mubr.msk.bf16.mxu0 %vm2967_vm0, %v2966_v33 }
 0x11b   :  { %v319_v42 = vpop.f32.mrb[0].mxu0 }
 0x11c   :  { %v321_v43 = vpop.f32.mrb[1].mxu0  ;;  %v320_v49 = vadd.f32 %v319_v42, %v3037_v46 }
 0x11d   :  { %v322_v44 = vadd.f32 %v321_v43, %v3034_v40  ;;  %v323_v45 = vpop.f32.mrb[2].mxu0 }
 0x11e   :  { %v325_v47 = vpop.f32.mrb[3].mxu0  ;;  %v2419_v54 = vpack.c.bf16 %v320_v49, %v320_v49  ;;  %v324_v58 = vadd.f32 %v323_v45, %v3037_v46 }
 0x11f   :  { %v2435_v48 = vpack.c.bf16 %v322_v44, %v322_v44  ;;  %v326_v50 = vadd.f32 %v325_v47, %v3034_v40 }
 0x120   :  { %v2420_v0 = vpack.c.bf16 %v324_v58, %v324_v58 }
 0x121   :  { %2580 = vmatpush3.bf16.xpose.msra.mxu1 %v2435_v48  ;;  %v2436_v56 = vpack.c.bf16 %v326_v50, %v326_v50  ;;  %v2565_v2 = vpop.f32.mrb[0].mxu1 }
 0x122   :  { %2585 = vmatprep.subr.bf16.mxu1 %v2966_v33  ;;  %v441_v4 = vadd.f32 %v2565_v2, %v3032_v38  ;;  %v432_v5 = vpop.f32.mrb[1].mxu1 }
 0x123   :  { %v329_v51 = vpop.f32.mrb[4].mxu0  ;;  %v3053_v7 = vadd.f32 %v432_v5, %v3032_v38  ;;  %v2566_v8 = vpop.f32.mrb[2].mxu1 }
 0x124   :  { %v331_v52 = vpop.f32.mrb[5].mxu0  ;;  %v2453_v9 = vpack.c.bf16 %v441_v4, %v441_v4  ;;  %v444_v10 = vadd.f32 %v2566_v8, %v3032_v38  ;;  %v435_v11 = vpop.f32.mrb[3].mxu1  ;;  %v330_v12 = vadd.f32 %v329_v51, %v3037_v46 }
 0x125   :  { %v333_v53 = vpop.f32.mrb[6].mxu0  ;;  %v332_v57 = vadd.f32 %v331_v52, %v3034_v40  ;;  %v3061_v13 = vadd.f32 %v435_v11, %v3032_v38 }
 0x126   :  { %v335_v55 = vpop.f32.mrb[7].mxu0  ;;  %v3066_v16 = vsel %vm1539_vm1, %v2453_v9, 0  ;;  %v2454_v17 = vpack.c.bf16 %v444_v10, %v444_v10  ;;  %v2421_v23 = vpack.c.bf16 %v330_v12, %v330_v12  ;;  %v334_v37 = vadd.f32 %v333_v53, %v3037_v46 }
 0x127   :  { %v2437_v61 = vpack.c.bf16 %v332_v57, %v332_v57  ;;  %v336_v14 = vadd.f32 %v335_v55, %v3034_v40 }
 0x128   :  { %2582 = vmatmul.mubr.bf16.vlgmr.msra.gmra.mrb[16].mxu1 %v2419_v54  ;;  %v3072_v22 = vsel %vm1539_vm1, %v2454_v17, 0  ;;  %v2422_v54 = vpack.c.bf16 %v334_v37, %v334_v37 }
 0x129   :  { %2586 = vmatpush3.bf16.xpose.msra.mxu1 %v2436_v56  ;;  %2587 = vmatprep.mubr.msk.bf16.mxu1 %vm2967_vm0, %v2966_v33  ;;  %v2569_v25 = vpop.f32.mrb[4].mxu1  ;;  %v2438_v26 = vpack.c.bf16 %v336_v14, %v336_v14 }
 0x12a   :  { %2591 = vmatprep.subr.bf16.mxu1 %v2966_v33  ;;  %v457_v28 = vadd.f32 %v2569_v25, %v3032_v38  ;;  %v448_v29 = vpop.f32.mrb[5].mxu1 }
 0x12b   :  { %v339_v59 = vpop.f32.mrb[8].mxu0  ;;  %v449_v31 = vadd.f32 %v448_v29, %v3032_v38  ;;  %v2570_v32 = vpop.f32.mrb[6].mxu1 }
 0x12c   :  { %v341_v60 = vpop.f32.mrb[9].mxu0  ;;  %v340_v6 = vadd.f32 %v339_v59, %v3037_v46  ;;  %v2457_v34 = vpack.c.bf16 %v457_v28, %v457_v28  ;;  %v460_v35 = vadd.f32 %v2570_v32, %v3032_v38  ;;  %v451_v36 = vpop.f32.mrb[7].mxu1 }
 0x12d   :  { %v342_v62 = vadd.f32 %v341_v60, %v3034_v40  ;;  %v3048_v63 = vpop.f32.mrb[10].mxu0  ;;  %v2455_v39 = vpack.c.bf16 %v449_v31, %v449_v31  ;;  %v452_v41 = vadd.f32 %v451_v36, %v3032_v38 }
 0x12e   :  { %v345_v1 = vpop.f32.mrb[11].mxu0  ;;  %v2423_v18 = vpack.c.bf16 %v340_v6, %v340_v6  ;;  %v3088_v44 = vsel %vm1539_vm1, %v2457_v34, 0  ;;  %v2458_v45 = vpack.c.bf16 %v460_v35, %v460_v35  ;;  %v344_v5 = vadd.f32 %v3048_v63, %v3037_v46 }
 0x12f   :  { %v2439_v3 = vpack.c.bf16 %v342_v62, %v342_v62  ;;  %v346_v42 = vadd.f32 %v345_v1, %v3034_v40  ;;  %v3091_v49 = vsel %vm1539_vm1, %v2455_v39, 0  ;;  %v2456_v50 = vpack.c.bf16 %v452_v41, %v452_v41 }
 0x130   :  { %2588 = vmatmul.mubr.bf16.vlgmr.msra.gmra.mrb[20].mxu1 %v2420_v0  ;;  %v3097_v53 = vsel %vm1539_vm1, %v2458_v45, 0 }
 0x131   :  { %2592 = vmatpush3.bf16.xpose.msra.mxu1 %v2437_v61  ;;  %2604 = vmatpush3.bf16.xpose.msra.mxu0 %v2439_v3  ;;  %v3100_v56 = vsel %vm1539_vm1, %v2456_v50, 0  ;;  %v2573_v57 = vpop.f32.mrb[8].mxu1  ;;  %v2440_v58 = vpack.c.bf16 %v346_v42, %v346_v42 }
 0x132   :  { %2593 = vmatprep.mubr.msk.bf16.mxu1 %vm2967_vm0, %v2966_v33  ;;  %2597 = vmatprep.subr.bf16.mxu1 %v2966_v33  ;;  %v473_v60 = vadd.f32 %v2573_v57, %v3032_v38  ;;  %v464_v61 = vpop.f32.mrb[9].mxu1 }
 0x133   :  { %v349_v15 = vpop.f32.mrb[12].mxu0  ;;  %2615 = vmatprep.subr.bf16.mxu0 %v2966_v33  ;;  %v465_v0 = vadd.f32 %v464_v61, %v3032_v38  ;;  %v2574_v1 = vpop.f32.mrb[10].mxu1 }
 0x134   :  { %v351_v19 = vpop.f32.mrb[13].mxu0  ;;  %v350_v30 = vadd.f32 %v349_v15, %v3037_v46  ;;  %v2461_v2 = vpack.c.bf16 %v473_v60, %v473_v60  ;;  %v476_v3 = vadd.f32 %v2574_v1, %v3032_v38  ;;  %v467_v4 = vpop.f32.mrb[11].mxu1 }
 0x135   :  { %v352_v20 = vadd.f32 %v351_v19, %v3034_v40  ;;  %v3069_v21 = vpop.f32.mrb[14].mxu0  ;;  %v2459_v6 = vpack.c.bf16 %v465_v0, %v465_v0  ;;  %v468_v8 = vadd.f32 %v467_v4, %v3032_v38 }
 0x136   :  { %v355_v24 = vpop.f32.mrb[15].mxu0  ;;  %v2425_v47 = vpack.c.bf16 %v350_v30, %v350_v30  ;;  %v3117_v11 = vsel %vm1539_vm1, %v2461_v2, 0  ;;  %v2462_v63 = vpack.c.bf16 %v476_v3, %v476_v3  ;;  %v354_v39 = vadd.f32 %v3069_v21, %v3037_v46 }
 0x137   :  { %v2441_v27 = vpack.c.bf16 %v352_v20, %v352_v20  ;;  %v356_v9 = vadd.f32 %v355_v24, %v3034_v40  ;;  %v3120_v15 = vsel %vm1539_vm1, %v2459_v6, 0  ;;  %v2460_v17 = vpack.c.bf16 %v468_v8, %v468_v8 }
 0x138   :  { %2594 = vmatmul.mubr.bf16.vlgmr.msra.gmra.mrb[24].mxu1 %v2421_v23  ;;  %2606 = vmatmul.mubr.bf16.vlgmr.msra.gmra.mrb[32].mxu0 %v2423_v18  ;;  %v3126_v20 = vsel %vm1539_vm1, %v2462_v63, 0  ;;  %v2424_v23 = vpack.c.bf16 %v344_v5, %v344_v5 }
 0x139   :  { %2598 = vmatpush3.bf16.xpose.msra.mxu1 %v2438_v26  ;;  %2616 = vmatpush3.bf16.xpose.msra.mxu0 %v2441_v27  ;;  %v3129_v25 = vsel %vm1539_vm1, %v2460_v17, 0  ;;  %v2577_v26 = vpop.f32.mrb[12].mxu1  ;;  %v2442_v27 = vpack.c.bf16 %v356_v9, %v356_v9 }
 0x13a   :  { %2599 = vmatprep.mubr.msk.bf16.mxu1 %vm2967_vm0, %v2966_v33  ;;  %2617 = vmatprep.mubr.msk.bf16.mxu0 %vm2967_vm0, %v2966_v33  ;;  %v489_v29 = vadd.f32 %v2577_v26, %v3032_v38  ;;  %v480_v30 = vpop.f32.mrb[13].mxu1 }
 0x13b   :  { %v359_v43 = vpop.f32.mrb[16].mxu0  ;;  %2609 = vmatprep.subr.bf16.mxu1 %v2966_v33  ;;  %2627 = vmatprep.subr.bf16.mxu0 %v2966_v33  ;;  %v481_v32 = vadd.f32 %v480_v30, %v3032_v38  ;;  %v2578_v34 = vpop.f32.mrb[14].mxu1 }
 0x13c   :  { %v361_v48 = vpop.f32.mrb[17].mxu0  ;;  %v360_v62 = vadd.f32 %v359_v43, %v3037_v46  ;;  %v2465_v35 = vpack.c.bf16 %v489_v29, %v489_v29  ;;  %v492_v36 = vadd.f32 %v2578_v34, %v3032_v38  ;;  %v483_v37 = vpop.f32.mrb[15].mxu1 }
 0x13d   :  { %v362_v51 = vadd.f32 %v361_v48, %v3034_v40  ;;  %v3094_v52 = vpop.f32.mrb[18].mxu0  ;;  %v2463_v41 = vpack.c.bf16 %v481_v32, %v481_v32  ;;  %v484_v42 = vadd.f32 %v483_v37, %v3032_v38 }
 0x13e   :  { %v365_v55 = vpop.f32.mrb[19].mxu0  ;;  %v2427_v12 = vpack.c.bf16 %v360_v62, %v360_v62  ;;  %v2466_v21 = vpack.c.bf16 %v492_v36, %v492_v36  ;;  %v364_v3 = vadd.f32 %v3094_v52, %v3037_v46 }
 0x13f   :  { %v2443_v59 = vpack.c.bf16 %v362_v51, %v362_v51  ;;  %v366_v43 = vadd.f32 %v365_v55, %v3034_v40  ;;  %v3149_v51 = vsel %vm1539_vm1, %v2463_v41, 0 }
 0x140   :  { %2600 = vmatmul.mubr.bf16.vlgmr.msra.gmra.mrb[28].mxu1 %v2422_v54  ;;  %2618 = vmatmul.mubr.bf16.vlgmr.msra.gmra.mrb[36].mxu0 %v2425_v47  ;;  %v3146_v47 = vsel %vm1539_vm1, %v2465_v35, 0  ;;  %v2464_v54 = vpack.c.bf16 %v484_v42, %v484_v42  ;;  %v3153_v55 = vsel %vm1539_vm1, %v2466_v21, 0  ;;  %v2428_v63 = vpack.c.bf16 %v364_v3, %v364_v3 }
 0x141   :  { %2610 = vmatpush3.bf16.xpose.msra.mxu1 %v2440_v58  ;;  %2628 = vmatpush3.bf16.xpose.msra.mxu0 %v2443_v59  ;;  %v2426_v58 = vpack.c.bf16 %v354_v39, %v354_v39  ;;  %v2444_v62 = vpack.c.bf16 %v366_v43, %v366_v43 }
 0x142   :  { %2611 = vmatprep.mubr.msk.bf16.mxu1 %vm2967_vm0, %v2966_v33  ;;  %2629 = vmatprep.mubr.msk.bf16.mxu0 %vm2967_vm0, %v2966_v33  ;;  %v3157_v61 = vsel %vm1539_vm1, %v2464_v54, 0 }
 0x143   :  { %v369_v10 = vpop.f32.mrb[20].mxu0  ;;  %2621 = vmatprep.subr.bf16.mxu1 %v2966_v33  ;;  %2639 = vmatprep.subr.bf16.mxu0 %v2966_v33 }
 0x144   :  { %v371_v14 = vpop.f32.mrb[21].mxu0  ;;  %v370_v31 = vadd.f32 %v369_v10, %v3037_v46 }
 0x145   :  { %v372_v18 = vadd.f32 %v371_v14, %v3034_v40  ;;  %v3123_v19 = vpop.f32.mrb[22].mxu0 }
 0x146   :  { %v375_v24 = vpop.f32.mrb[23].mxu0  ;;  %v2429_v48 = vpack.c.bf16 %v370_v31, %v370_v31 }
 0x147   :  { %v2445_v28 = vpack.c.bf16 %v372_v18, %v372_v18  ;;  %v376_v4 = vadd.f32 %v375_v24, %v3034_v40  ;;  %v374_v24 = vadd.f32 %v3123_v19, %v3037_v46  ;;  %v2452_v19 = vpack.c.bf16 %v3061_v13, %v3061_v13 }
 0x148   :  { %2612 = vmatmul.mubr.bf16.vlgmr.msra.gmra.mrb[32].mxu1 %v2424_v23  ;;  %2630 = vmatmul.mubr.bf16.vlgmr.msra.gmra.mrb[40].mxu0 %v2427_v12 }
 0x149   :  { %2622 = vmatpush3.bf16.xpose.msra.mxu1 %v2442_v27  ;;  %2640 = vmatpush3.bf16.xpose.msra.mxu0 %v2445_v28  ;;  %v2446_v14 = vpack.c.bf16 %v376_v4, %v376_v4  ;;  %v2430_v27 = vpack.c.bf16 %v374_v24, %v374_v24  ;;  %v1587_v31 = vsel %vm1539_vm1, %v2452_v19, 0 }
 0x14a   :  { %2623 = vmatprep.mubr.msk.bf16.mxu1 %vm2967_vm0, %v2966_v33  ;;  %2641 = vmatprep.mubr.msk.bf16.mxu0 %vm2967_vm0, %v2966_v33 }
 0x14b   :  { %v379_v45 = vpop.f32.mrb[24].mxu0  ;;  %2633 = vmatprep.subr.bf16.mxu1 %v2966_v33  ;;  %2651 = vmatprep.subr.bf16.mxu0 %v2966_v33 }
 0x14c   :  { %v381_v50 = vpop.f32.mrb[25].mxu0  ;;  %v380_v2 = vadd.f32 %v379_v45, %v3037_v46 }
 0x14d   :  { %v382_v57 = vadd.f32 %v381_v50, %v3034_v40  ;;  %v383_v38 = vpop.f32.mrb[26].mxu0 }
 0x14e   :  { %v384_v59 = vadd.f32 %v383_v38, %v3037_v46  ;;  %v385_v60 = vpop.f32.mrb[27].mxu0  ;;  %v2431_v6 = vpack.c.bf16 %v380_v2, %v380_v2 }
 0x14f   :  { %v2447_v0 = vpack.c.bf16 %v382_v57, %v382_v57  ;;  %v386_v1 = vadd.f32 %v385_v60, %v3034_v40 }
 0x150   :  { %2624 = vmatmul.mubr.bf16.vlgmr.msra.gmra.mrb[36].mxu1 %v2426_v58  ;;  %2642 = vmatmul.mubr.bf16.vlgmr.msra.gmra.mrb[44].mxu0 %v2429_v48 }
 0x151   :  { %2634 = vmatpush3.bf16.xpose.msra.mxu1 %v2444_v62  ;;  %2652 = vmatpush3.bf16.xpose.msra.mxu0 %v2447_v0  ;;  %v2448_v28 = vpack.c.bf16 %v386_v1, %v386_v1 }
 0x152   :  { %2635 = vmatprep.mubr.msk.bf16.mxu1 %vm2967_vm0, %v2966_v33  ;;  %2653 = vmatprep.mubr.msk.bf16.mxu0 %vm2967_vm0, %v2966_v33 }
 0x153   :  { %v389_v5 = vpop.f32.mrb[28].mxu0  ;;  %2645 = vmatprep.subr.bf16.mxu1 %v2966_v33  ;;  %2663 = vmatprep.subr.bf16.mxu0 %v2966_v33 }
 0x154   :  { %v391_v8 = vpop.f32.mrb[29].mxu0  ;;  %v390_v23 = vadd.f32 %v389_v5, %v3037_v46 }
 0x155   :  { %v392_v9 = vadd.f32 %v391_v8, %v3034_v40  ;;  %v393_v10 = vpop.f32.mrb[30].mxu0 }
 0x156   :  { %v394_v52 = vadd.f32 %v393_v10, %v3037_v46  ;;  %v395_v12 = vpop.f32.mrb[31].mxu0  ;;  %v2433_v26 = vpack.c.bf16 %v390_v23, %v390_v23  ;;  %v2432_v46 = vpack.c.bf16 %v384_v59, %v384_v59 }
 0x157   :  { %v2449_v17 = vpack.c.bf16 %v392_v9, %v392_v9  ;;  %v396_v18 = vadd.f32 %v395_v12, %v3034_v40  ;;  %v2451_v40 = vpack.c.bf16 %v3053_v7, %v3053_v7 }
 0x158   :  { %2636 = vmatmul.mubr.bf16.vlgmr.msra.gmra.mrb[40].mxu1 %v2428_v63  ;;  %2654 = vmatmul.mubr.bf16.vlgmr.msra.gmra.mrb[48].mxu0 %v2431_v6  ;;  %v2434_v30 = vpack.c.bf16 %v394_v52, %v394_v52 }
 0x159   :  { %2646 = vmatpush3.bf16.xpose.msra.mxu1 %v2446_v14  ;;  %2664 = vmatpush3.bf16.xpose.msra.mxu0 %v2449_v17  ;;  %v1541_v29 = vsel %vm1539_vm1, %v2451_v40, 0  ;;  %v2450_v7 = vpack.c.bf16 %v396_v18, %v396_v18 }
 0x15a   :  { %2647 = vmatprep.mubr.msk.bf16.mxu1 %vm2967_vm0, %v2966_v33  ;;  %2665 = vmatprep.mubr.msk.bf16.mxu0 %vm2967_vm0, %v2966_v33 }
 0x15b   :  { %2657 = vmatprep.subr.bf16.mxu1 %v2966_v33  ;;  %2675 = vmatprep.subr.bf16.mxu0 %v2966_v33 }
 0x160   :  { %2648 = vmatmul.mubr.bf16.vlgmr.msra.gmra.mrb[44].mxu1 %v2430_v27  ;;  %2666 = vmatmul.mubr.bf16.vlgmr.msra.gmra.mrb[52].mxu0 %v2433_v26 }
 0x161   :  { %2658 = vmatpush3.bf16.xpose.msra.mxu1 %v2448_v28  ;;  %2659 = vmatprep.mubr.msk.bf16.mxu1 %vm2967_vm0, %v2966_v33 }
 0x162   :  { %2669 = vmatprep.subr.bf16.mxu1 %v2966_v33  ;;  %2676 = vmatpush3.bf16.msra.mxu0 %v1541_v29 }
 0x163   :  { %2677 = vmatprep.mubr.msk.bf16.mxu0 %vm2967_vm0, %v2966_v33  ;;  %2687 = vmatprep.subr.bf16.mxu0 %v2966_v33 }
 0x168   :  { %2660 = vmatmul.mubr.bf16.vlgmr.msra.gmra.mrb[48].mxu1 %v2432_v46 }
 0x169   :  { %2670 = vmatpush3.bf16.xpose.msra.mxu1 %v2450_v7  ;;  %2671 = vmatprep.mubr.msk.bf16.mxu1 %vm2967_vm0, %v2966_v33 }
 0x16a   :  { %2681 = vmatprep.subr.bf16.mxu1 %v2966_v33 }
 0x170   :  { %2672 = vmatmul.mubr.bf16.vlgmr.msra.gmra.mrb[52].mxu1 %v2434_v30 }
 0x171   :  { %2682 = vmatpush3.bf16.msra.mxu1 %v1587_v31  ;;  %2683 = vmatprep.mubr.msk.bf16.mxu1 %vm2967_vm0, %v2966_v33 }
 0x172   :  { %2693 = vmatprep.subr.bf16.mxu1 %v2966_v33 }
 0x1fb   :  { %v3200_v32 = vpop.f32.mrb[16].mxu1 }
 0x1fc   :  { %v2583_v34 = vpop.f32.mrb[17].mxu1  ;;  %v1312_v35 = vsel %vm1311_vm2, %v3200_v32, -inf }
 0x1fd   :  { %1313 = vmax.xlane.f32.xlu0 %v1312_v35  ;;  %v708_v13 = vpop.f32.mrb[18].mxu1 }
 0x1fe   :  { %v2584_v36 = vpop.f32.mrb[19].mxu1 }
 0x203   :  { %v3204_v37 = vpop.f32.mrb[20].mxu1 }
 0x204   :  { %v2589_v39 = vpop.f32.mrb[21].mxu1  ;;  %v1315_v41 = vsel %vm1311_vm2, %v3204_v37, -inf }
 0x205   :  { %1316 = vmax.xlane.f32.xlu0 %v1315_v41  ;;  %v748_v42 = vpop.f32.mrb[22].mxu1 }
 0x206   :  { %v2590_v43 = vpop.f32.mrb[23].mxu1 }
 0x20b   :  { %v3208_v45 = vpop.f32.mrb[24].mxu1  ;;  %v3210_v21 = vpop.f32.mrb[32].mxu0 }
 0x20c   :  { %v2595_v48 = vpop.f32.mrb[25].mxu1  ;;  %v2607_v50 = vpop.f32.mrb[33].mxu0  ;;  %v1324_v54 = vsel %vm1311_vm2, %v3210_v21, -inf  ;;  %v1318_v57 = vsel %vm1311_vm2, %v3208_v45, -inf }
 0x20d   :  { %v868_v38 = vpop.f32.mrb[34].mxu0  ;;  %1325 = vmax.xlane.f32.xlu0 %v1324_v54  ;;  %1319 = vmax.xlane.f32.xlu1 %v1318_v57  ;;  %v788_v58 = vpop.f32.mrb[26].mxu1 }
 0x20e   :  { %v2596_v59 = vpop.f32.mrb[27].mxu1  ;;  %v2608_v60 = vpop.f32.mrb[35].mxu0 }
 0x213   :  { %v3216_v62 = vpop.f32.mrb[28].mxu1  ;;  %v3218_v0 = vpop.f32.mrb[36].mxu0 }
 0x214   :  { %v2601_v1 = vpop.f32.mrb[29].mxu1  ;;  %v1330_v2 = vsel %vm1311_vm2, %v3218_v0, -inf  ;;  %v1321_v3 = vsel %vm1311_vm2, %v3216_v62, -inf  ;;  %v2619_v4 = vpop.f32.mrb[37].mxu0 }
 0x215   :  { %1331 = vmax.xlane.f32.xlu0 %v1330_v2  ;;  %1322 = vmax.xlane.f32.xlu1 %v1321_v3  ;;  %v828_v5 = vpop.f32.mrb[30].mxu1  ;;  %v948_v6 = vpop.f32.mrb[38].mxu0 }
 0x216   :  { %v2602_v8 = vpop.f32.mrb[31].mxu1  ;;  %v2620_v9 = vpop.f32.mrb[39].mxu0 }
 0x21b   :  { %v3224_v10 = vpop.f32.mrb[32].mxu1  ;;  %v3226_v63 = vpop.f32.mrb[40].mxu0 }
 0x21c   :  { %v2613_v52 = vpop.f32.mrb[33].mxu1  ;;  %v1336_v12 = vsel %vm1311_vm2, %v3226_v63, -inf  ;;  %v1327_v14 = vsel %vm1311_vm2, %v3224_v10, -inf  ;;  %v2631_v17 = vpop.f32.mrb[41].mxu0 }
 0x21d   :  { %1337 = vmax.xlane.f32.xlu0 %v1336_v12  ;;  %1328 = vmax.xlane.f32.xlu1 %v1327_v14  ;;  %v908_v18 = vpop.f32.mrb[34].mxu1  ;;  %v1028_v23 = vpop.f32.mrb[42].mxu0 }
 0x21e   :  { %v2614_v24 = vpop.f32.mrb[35].mxu1  ;;  %v2632_v40 = vpop.f32.mrb[43].mxu0 }
 0x223   :  { %v3232_v26 = vpop.f32.mrb[36].mxu1  ;;  %v3234_v27 = vpop.f32.mrb[44].mxu0 }
 0x224   :  { %v1342_v28 = vsel %vm1311_vm2, %v3234_v27, -inf  ;;  %v1333_v29 = vsel %vm1311_vm2, %v3232_v26, -inf  ;;  %v2625_v46 = vpop.f32.mrb[37].mxu1  ;;  %v2643_v7 = vpop.f32.mrb[45].mxu0 }
 0x225   :  { %1343 = vmax.xlane.f32.xlu0 %v1342_v28  ;;  %1334 = vmax.xlane.f32.xlu1 %v1333_v29  ;;  %v988_v19 = vpop.f32.mrb[38].mxu1  ;;  %v1108_v30 = vpop.f32.mrb[46].mxu0 }
 0x226   :  { %v2626_v31 = vpop.f32.mrb[39].mxu1  ;;  %v2644_v34 = vpop.f32.mrb[47].mxu0 }
 0x22b   :  { %v3240_v35 = vpop.f32.mrb[40].mxu1  ;;  %v3242_v13 = vpop.f32.mrb[48].mxu0 }
 0x22c   :  { %v1348_v36 = vsel %vm1311_vm2, %v3242_v13, -inf  ;;  %v1339_v39 = vsel %vm1311_vm2, %v3240_v35, -inf  ;;  %v2637_v41 = vpop.f32.mrb[41].mxu1  ;;  %v2655_v42 = vpop.f32.mrb[49].mxu0 }
 0x22d   :  { %1349 = vmax.xlane.f32.xlu0 %v1348_v36  ;;  %1340 = vmax.xlane.f32.xlu1 %v1339_v39  ;;  %v1068_v43 = vpop.f32.mrb[42].mxu1  ;;  %v1188_v48 = vpop.f32.mrb[50].mxu0 }
 0x22e   :  { %v2638_v50 = vpop.f32.mrb[43].mxu1  ;;  %v2656_v54 = vpop.f32.mrb[51].mxu0 }
 0x233   :  { %v3248_v57 = vpop.f32.mrb[44].mxu1  ;;  %v3250_v38 = vpop.f32.mrb[52].mxu0 }
 0x234   :  { %v1354_v58 = vsel %vm1311_vm2, %v3250_v38, -inf  ;;  %v1345_v59 = vsel %vm1311_vm2, %v3248_v57, -inf  ;;  %v2649_v60 = vpop.f32.mrb[45].mxu1  ;;  %v2667_v1 = vpop.f32.mrb[53].mxu0 }
 0x235   :  { %1355 = vmax.xlane.f32.xlu0 %v1354_v58  ;;  %1346 = vmax.xlane.f32.xlu1 %v1345_v59  ;;  %v1148_v2 = vpop.f32.mrb[46].mxu1  ;;  %v1268_v3 = vpop.f32.mrb[54].mxu0 }
 0x236   :  { %v2650_v4 = vpop.f32.mrb[47].mxu1  ;;  %v2668_v5 = vpop.f32.mrb[55].mxu0 }
 0x23b   :  { %v3256_v6 = vpop.f32.mrb[48].mxu1 }
 0x23c   :  { %v1351_v8 = vsel %vm1311_vm2, %v3256_v6, -inf  ;;  %v2661_v9 = vpop.f32.mrb[49].mxu1 }
 0x23d   :  { %1352 = vmax.xlane.f32.xlu1 %v1351_v8  ;;  %v1228_v52 = vpop.f32.mrb[50].mxu1 }
 0x23e   :  { %v2662_v12 = vpop.f32.mrb[51].mxu1 }
 0x243   :  { %v3260_v14 = vpop.f32.mrb[52].mxu1 }
 0x244   :  { %v1357_v17 = vsel %vm1311_vm2, %v3260_v14, -inf  ;;  %v2673_v18 = vpop.f32.mrb[53].mxu1 }
 0x245   :  { %1358 = vmax.xlane.f32.xlu1 %v1357_v17  ;;  %v1308_v23 = vpop.f32.mrb[54].mxu1 }
 0x246   :  { %v2674_v24 = vpop.f32.mrb[55].mxu1 }
 0x28a   :  { %v1314_v40 = vpop.xlane.xlu0 %1313 }
 0x28b   :  { %v1360_v28 = vsub.f32 %v3200_v32, %v1314_v40 }
 0x28d   :  { %v1376_v29 = vmul.f32 1.442695, %v1360_v28 }
 0x28f   :  { %2823 = vpow2.f32 %v1376_v29 }
 0x292   :  { %v1317_v46 = vpop.xlane.xlu0 %1316 }
 0x293   :  { %v1361_v7 = vsub.f32 %v3204_v37, %v1317_v46 }
 0x295   :  { %v1378_v19 = vmul.f32 1.442695, %v1361_v7 }
 0x297   :  { %2825 = vpow2.f32 %v1378_v19 }
 0x299   :  { %v2824_v30 = vpop.eup %2823 }
 0x29a   :  { %v1326_v31 = vpop.xlane.xlu0 %1325  ;;  %v1320_v34 = vpop.xlane.xlu1 %1319  ;;  %v1408_v36 = vsel %vm1311_vm2, %v2824_v30, 0.0  ;;  %v1520_v39 = vpack.c.bf16 %v2824_v30, %v2824_v30 }
 0x29b   :  { %v1364_v41 = vsub.f32 %v3210_v21, %v1326_v31  ;;  %v1362_v42 = vsub.f32 %v3208_v45, %v1320_v34  ;;  %1409 = vadd.xlane.f32.xlu0 %v1408_v36 }
 0x29c   :  { %2678 = vmatmul.mubr.msk.bf16.vlgmr.msra.gmra.mrb[56].mxu0 %vm1311_vm2, %v1520_v39 }
 0x29d   :  { %v1380_v32 = vmul.f32 1.442695, %v1362_v42  ;;  %2688 = vmatpush3.bf16.msra.mxu0 %v3066_v16  ;;  %2689 = vmatprep.mubr.msk.bf16.mxu0 %vm2967_vm0, %v2966_v33  ;;  %v1384_v37 = vmul.f32 1.442695, %v1364_v41 }
 0x29e   :  { %2699 = vmatprep.subr.bf16.mxu0 %v2966_v33 }
 0x29f   :  { %2827 = vpow2.f32 %v1380_v32 }
 0x2a0   :  { %2829 = vpow2.f32 %v1384_v37 }
 0x2a1   :  { %v2826_v43 = vpop.eup %2825 }
 0x2a2   :  { %v1332_v48 = vpop.xlane.xlu0 %1331  ;;  %v1323_v50 = vpop.xlane.xlu1 %1322  ;;  %v1411_v21 = vsel %vm1311_vm2, %v2826_v43, 0.0  ;;  %v1521_v45 = vpack.c.bf16 %v2826_v43, %v2826_v43 }
 0x2a3   :  { %v1366_v54 = vsub.f32 %v3218_v0, %v1332_v48  ;;  %v1363_v58 = vsub.f32 %v3216_v62, %v1323_v50  ;;  %1412 = vadd.xlane.f32.xlu1 %v1411_v21 }
 0x2a4   :  { %2684 = vmatmul.mubr.msk.bf16.vlgmr.msra.gmra.mrb[56].mxu1 %vm1311_vm2, %v1521_v45 }
 0x2a5   :  { %v1388_v16 = vmul.f32 1.442695, %v1366_v54  ;;  %v1382_v59 = vmul.f32 1.442695, %v1363_v58  ;;  %2694 = vmatpush3.bf16.msra.mxu1 %v3072_v22  ;;  %2695 = vmatprep.mubr.msk.bf16.mxu1 %vm2967_vm0, %v2966_v33 }
 0x2a6   :  { %2705 = vmatprep.subr.bf16.mxu1 %v2966_v33 }
 0x2a7   :  { %2831 = vpow2.f32 %v1388_v16 }
 0x2a8   :  { %2833 = vpow2.f32 %v1382_v59 }
 0x2a9   :  { %v2828_v60 = vpop.eup %2827 }
 0x2aa   :  { %v1338_v1 = vpop.xlane.xlu0 %1337  ;;  %v1329_v2 = vpop.xlane.xlu1 %1328  ;;  %v1414_v3 = vsel %vm1311_vm2, %v2828_v60, 0.0  ;;  %v1522_v4 = vpack.c.bf16 %v2828_v60, %v2828_v60 }
 0x2ab   :  { %v1368_v0 = vsub.f32 %v3226_v63, %v1338_v1  ;;  %v1365_v62 = vsub.f32 %v3224_v10, %v1329_v2  ;;  %v2830_v5 = vpop.eup %2829  ;;  %1415 = vadd.xlane.f32.xlu0 %v1414_v3 }
 0x2ac   :  { %2690 = vmatmul.mubr.msk.bf16.vlgmr.msra.gmra.mrb[60].mxu0 %vm1311_vm2, %v1522_v4  ;;  %v1420_v9 = vsel %vm1311_vm2, %v2830_v5, 0.0  ;;  %v1524_v18 = vpack.c.bf16 %v2830_v5, %v2830_v5 }
 0x2ad   :  { %v1392_v22 = vmul.f32 1.442695, %v1368_v0  ;;  %v1386_v8 = vmul.f32 1.442695, %v1365_v62  ;;  %2700 = vmatpush3.bf16.msra.mxu0 %v3091_v49  ;;  %2701 = vmatprep.mubr.msk.bf16.mxu0 %vm2967_vm0, %v2966_v33 }
 0x2ae   :  { %2711 = vmatprep.subr.bf16.mxu0 %v2966_v33 }
 0x2af   :  { %2835 = vpow2.f32 %v1392_v22  ;;  %1421 = vadd.xlane.f32.xlu0 %v1420_v9 }
 0x2b0   :  { %2837 = vpow2.f32 %v1386_v8 }
 0x2b1   :  { %v2832_v10 = vpop.eup %2831 }
 0x2b2   :  { %v2834_v63 = vpop.eup %2833  ;;  %v1344_v52 = vpop.xlane.xlu0 %1343  ;;  %v1426_v17 = vsel %vm1311_vm2, %v2832_v10, 0.0  ;;  %v1526_v19 = vpack.c.bf16 %v2832_v10, %v2832_v10 }
 0x2b3   :  { %v1335_v12 = vpop.xlane.xlu1 %1334  ;;  %v1370_v23 = vsub.f32 %v3234_v27, %v1344_v52  ;;  %v1417_v24 = vsel %vm1311_vm2, %v2834_v63, 0.0  ;;  %v1523_v40 = vpack.c.bf16 %v2834_v63, %v2834_v63  ;;  %1427 = vadd.xlane.f32.xlu0 %v1426_v17 }
 0x2b4   :  { %v1367_v49 = vsub.f32 %v3232_v26, %v1335_v12  ;;  %1418 = vadd.xlane.f32.xlu1 %v1417_v24  ;;  %2702 = vmatmul.mubr.msk.bf16.vlgmr.msra.gmra.mrb[64].mxu0 %vm1311_vm2, %v1524_v18 }
 0x2b5   :  { %v1396_v28 = vmul.f32 1.442695, %v1370_v23  ;;  %2696 = vmatmul.mubr.msk.bf16.vlgmr.msra.gmra.mrb[60].mxu1 %vm1311_vm2, %v1523_v40  ;;  %2712 = vmatpush3.bf16.msra.mxu0 %v3088_v44 }
 0x2b6   :  { %v1390_v29 = vmul.f32 1.442695, %v1367_v49  ;;  %2706 = vmatpush3.bf16.msra.mxu1 %v3100_v56  ;;  %2713 = vmatprep.mubr.msk.bf16.mxu0 %vm2967_vm0, %v2966_v33 }
 0x2b7   :  { %2839 = vpow2.f32 %v1396_v28  ;;  %2723 = vmatprep.subr.bf16.mxu0 %v2966_v33  ;;  %2707 = vmatprep.mubr.msk.bf16.mxu1 %vm2967_vm0, %v2966_v33 }
 0x2b8   :  { %2841 = vpow2.f32 %v1390_v29  ;;  %2717 = vmatprep.subr.bf16.mxu1 %v2966_v33 }
 0x2b9   :  { %v2836_v26 = vpop.eup %2835 }
 0x2ba   :  { %v2838_v27 = vpop.eup %2837  ;;  %v1350_v46 = vpop.xlane.xlu0 %1349  ;;  %v1432_v56 = vsel %vm1311_vm2, %v2836_v26, 0.0  ;;  %v1528_v32 = vpack.c.bf16 %v2836_v26, %v2836_v26 }
 0x2bb   :  { %v1341_v7 = vpop.xlane.xlu1 %1340  ;;  %v1372_v44 = vsub.f32 %v3242_v13, %v1350_v46  ;;  %1433 = vadd.xlane.f32.xlu0 %v1432_v56  ;;  %v1423_v31 = vsel %vm1311_vm2, %v2838_v27, 0.0  ;;  %v1525_v34 = vpack.c.bf16 %v2838_v27, %v2838_v27 }
 0x2bc   :  { %v1369_v30 = vsub.f32 %v3240_v35, %v1341_v7  ;;  %1424 = vadd.xlane.f32.xlu1 %v1423_v31  ;;  %2714 = vmatmul.mubr.msk.bf16.vlgmr.msra.gmra.mrb[68].mxu0 %vm1311_vm2, %v1526_v19 }
 0x2bd   :  { %v1400_v36 = vmul.f32 1.442695, %v1372_v44  ;;  %2708 = vmatmul.mubr.msk.bf16.vlgmr.msra.gmra.mrb[64].mxu1 %vm1311_vm2, %v1525_v34  ;;  %2724 = vmatpush3.bf16.msra.mxu0 %v3120_v15 }
 0x2be   :  { %v1394_v39 = vmul.f32 1.442695, %v1369_v30  ;;  %2718 = vmatpush3.bf16.msra.mxu1 %v3097_v53  ;;  %2725 = vmatprep.mubr.msk.bf16.mxu0 %vm2967_vm0, %v2966_v33 }
 0x2bf   :  { %2843 = vpow2.f32 %v1400_v36  ;;  %2735 = vmatprep.subr.bf16.mxu0 %v2966_v33  ;;  %2719 = vmatprep.mubr.msk.bf16.mxu1 %vm2967_vm0, %v2966_v33 }
 0x2c0   :  { %2845 = vpow2.f32 %v1394_v39  ;;  %2729 = vmatprep.subr.bf16.mxu1 %v2966_v33 }
 0x2c1   :  { %v2840_v35 = vpop.eup %2839 }
 0x2c2   :  { %v2842_v13 = vpop.eup %2841  ;;  %v1356_v41 = vpop.xlane.xlu0 %1355  ;;  %v1438_v53 = vsel %vm1311_vm2, %v2840_v35, 0.0  ;;  %v1530_v16 = vpack.c.bf16 %v2840_v35, %v2840_v35 }
 0x2c3   :  { %v1347_v42 = vpop.xlane.xlu1 %1346  ;;  %v1374_v15 = vsub.f32 %v3250_v38, %v1356_v41  ;;  %1439 = vadd.xlane.f32.xlu0 %v1438_v53  ;;  %v1429_v43 = vsel %vm1311_vm2, %v2842_v13, 0.0  ;;  %v1527_v48 = vpack.c.bf16 %v2842_v13, %v2842_v13 }
 0x2c4   :  { %v1371_v37 = vsub.f32 %v3248_v57, %v1347_v42  ;;  %1430 = vadd.xlane.f32.xlu1 %v1429_v43  ;;  %2726 = vmatmul.mubr.msk.bf16.vlgmr.msra.gmra.mrb[72].mxu0 %vm1311_vm2, %v1528_v32 }
 0x2c5   :  { %v1404_v50 = vmul.f32 1.442695, %v1374_v15  ;;  %2720 = vmatmul.mubr.msk.bf16.vlgmr.msra.gmra.mrb[68].mxu1 %vm1311_vm2, %v1527_v48  ;;  %2736 = vmatpush3.bf16.msra.mxu0 %v3117_v11 }
 0x2c6   :  { %v1398_v21 = vmul.f32 1.442695, %v1371_v37  ;;  %2730 = vmatpush3.bf16.msra.mxu1 %v3129_v25  ;;  %2737 = vmatprep.mubr.msk.bf16.mxu0 %vm2967_vm0, %v2966_v33 }
 0x2c7   :  { %2847 = vpow2.f32 %v1404_v50  ;;  %2747 = vmatprep.subr.bf16.mxu0 %v2966_v33  ;;  %2731 = vmatprep.mubr.msk.bf16.mxu1 %vm2967_vm0, %v2966_v33 }
 0x2c8   :  { %2849 = vpow2.f32 %v1398_v21  ;;  %2741 = vmatprep.subr.bf16.mxu1 %v2966_v33 }
 0x2c9   :  { %v2844_v57 = vpop.eup %2843 }
 0x2ca   :  { %v2846_v38 = vpop.eup %2845  ;;  %v1353_v45 = vpop.xlane.xlu1 %1352  ;;  %v1444_v54 = vsel %vm1311_vm2, %v2844_v57, 0.0  ;;  %v1532_v62 = vpack.c.bf16 %v2844_v57, %v2844_v57 }
 0x2cb   :  { %v1373_v25 = vsub.f32 %v3256_v6, %v1353_v45  ;;  %1445 = vadd.xlane.f32.xlu0 %v1444_v54  ;;  %v1435_v11 = vsel %vm1311_vm2, %v2846_v38, 0.0  ;;  %v1529_v58 = vpack.c.bf16 %v2846_v38, %v2846_v38 }
 0x2cc   :  { %1436 = vadd.xlane.f32.xlu1 %v1435_v11  ;;  %2738 = vmatmul.mubr.msk.bf16.vlgmr.msra.gmra.mrb[76].mxu0 %vm1311_vm2, %v1530_v16 }
 0x2cd   :  { %v1402_v59 = vmul.f32 1.442695, %v1373_v25  ;;  %2732 = vmatmul.mubr.msk.bf16.vlgmr.msra.gmra.mrb[72].mxu1 %vm1311_vm2, %v1529_v58  ;;  %2748 = vmatpush3.bf16.msra.mxu0 %v3149_v51 }
 0x2ce   :  { %2742 = vmatpush3.bf16.msra.mxu1 %v3126_v20  ;;  %2749 = vmatprep.mubr.msk.bf16.mxu0 %vm2967_vm0, %v2966_v33 }
 0x2cf   :  { %2851 = vpow2.f32 %v1402_v59  ;;  %2759 = vmatprep.subr.bf16.mxu0 %v2966_v33  ;;  %2743 = vmatprep.mubr.msk.bf16.mxu1 %vm2967_vm0, %v2966_v33 }
 0x2d0   :  { %2753 = vmatprep.subr.bf16.mxu1 %v2966_v33 }
 0x2d1   :  { %v2848_v6 = vpop.eup %2847 }
 0x2d2   :  { %v2850_v60 = vpop.eup %2849  ;;  %v1359_v1 = vpop.xlane.xlu1 %1358  ;;  %v1450_v2 = vsel %vm1311_vm2, %v2848_v6, 0.0  ;;  %v1534_v22 = vpack.c.bf16 %v2848_v6, %v2848_v6 }
 0x2d3   :  { %v1375_v20 = vsub.f32 %v3260_v14, %v1359_v1  ;;  %1451 = vadd.xlane.f32.xlu0 %v1450_v2  ;;  %v1441_v51 = vsel %vm1311_vm2, %v2850_v60, 0.0  ;;  %v1531_v0 = vpack.c.bf16 %v2850_v60, %v2850_v60 }
 0x2d4   :  { %1442 = vadd.xlane.f32.xlu1 %v1441_v51  ;;  %2750 = vmatmul.mubr.msk.bf16.vlgmr.msra.gmra.mrb[80].mxu0 %vm1311_vm2, %v1532_v62 }
 0x2d5   :  { %v1406_v3 = vmul.f32 1.442695, %v1375_v20  ;;  %2744 = vmatmul.mubr.msk.bf16.vlgmr.msra.gmra.mrb[76].mxu1 %vm1311_vm2, %v1531_v0  ;;  %2760 = vmatpush3.bf16.msra.mxu0 %v3146_v47 }
 0x2d6   :  { %2754 = vmatpush3.bf16.msra.mxu1 %v3157_v61  ;;  %2755 = vmatprep.mubr.msk.bf16.mxu1 %vm2967_vm0, %v2966_v33 }
 0x2d7   :  { %2853 = vpow2.f32 %v1406_v3  ;;  %2761 = vmatprep.mubr.msk.bf16.mxu0 %vm2967_vm0, %v2966_v33  ;;  %2765 = vmatprep.subr.bf16.mxu1 %v2966_v33 }
 0x2d9   :  { %v2852_v14 = vpop.eup %2851 }
 0x2da   :  { %v1447_v4 = vsel %vm1311_vm2, %v2852_v14, 0.0  ;;  %v1533_v5 = vpack.c.bf16 %v2852_v14, %v2852_v14 }
 0x2db   :  { %1448 = vadd.xlane.f32.xlu1 %v1447_v4 }
 0x2dc   :  { %2762 = vmatmul.mubr.msk.bf16.vlgmr.msra.gmra.mrb[84].mxu0 %vm1311_vm2, %v1534_v22 }
 0x2dd   :  { %2756 = vmatmul.mubr.msk.bf16.vlgmr.msra.gmra.mrb[80].mxu1 %vm1311_vm2, %v1533_v5 }
 0x2de   :  { %2766 = vmatpush3.bf16.msra.mxu1 %v3153_v55  ;;  %2767 = vmatprep.mubr.msk.bf16.mxu1 %vm2967_vm0, %v2966_v33 }
 0x2e1   :  { %v2854_v47 = vpop.eup %2853 }
 0x2e2   :  { %v1453_v61 = vsel %vm1311_vm2, %v2854_v47, 0.0  ;;  %v1535_v8 = vpack.c.bf16 %v2854_v47, %v2854_v47 }
 0x2e3   :  { %1454 = vadd.xlane.f32.xlu1 %v1453_v61 }
 0x2e5   :  { %2768 = vmatmul.mubr.msk.bf16.vlgmr.msra.gmra.mrb[84].mxu1 %vm1311_vm2, %v1535_v8 }
 0x328   :  { %v1410_v9 = vpop.xlane.xlu0 %1409 }
 0x329   :  { %2855 = vrcp.f32 %v1410_v9 }
 0x330   :  { %v1413_v10 = vpop.xlane.xlu1 %1412 }
 0x331   :  { %2857 = vrcp.f32 %v1413_v10 }
 0x333   :  { %v2856_v63 = vpop.eup %2855 }
 0x334   :  { %v1472_v52 = vmul.f32 %v2856_v63, %v1410_v9 }
 0x336   :  { %v1488_v17 = vsub.f32 2.0, %v1472_v52 }
 0x338   :  { %v1416_v12 = vpop.xlane.xlu0 %1415  ;;  %v1504_v33 = vmul.f32 %v2856_v63, %v1488_v17 }
 0x339   :  { %2859 = vrcp.f32 %v1416_v12 }
 0x33b   :  { %v2858_v55 = vpop.eup %2857 }
 0x33c   :  { %v1473_v18 = vmul.f32 %v2858_v55, %v1413_v10  ;;  %v1422_v23 = vpop.xlane.xlu0 %1421 }
 0x33d   :  { %2861 = vrcp.f32 %v1422_v23 }
 0x33e   :  { %v1489_v26 = vsub.f32 2.0, %v1473_v18 }
 0x340   :  { %v1428_v7 = vpop.xlane.xlu0 %1427  ;;  %v1505_v56 = vmul.f32 %v2858_v55, %v1489_v26 }
 0x341   :  { %v1419_v49 = vpop.xlane.xlu1 %1418 }
 0x342   :  { %2863 = vrcp.f32 %v1419_v49 }
 0x343   :  { %v2860_v46 = vpop.eup %2859  ;;  %2865 = vrcp.f32 %v1428_v7 }
 0x344   :  { %v1474_v19 = vmul.f32 %v2860_v46, %v1416_v12 }
 0x346   :  { %v1490_v13 = vsub.f32 2.0, %v1474_v19 }
 0x347   :  { %v2862_v35 = vpop.eup %2861 }
 0x348   :  { %v1434_v42 = vpop.xlane.xlu0 %1433  ;;  %v1476_v53 = vmul.f32 %v2862_v35, %v1422_v23  ;;  %v1506_v37 = vmul.f32 %v2860_v46, %v1490_v13 }
 0x349   :  { %v1425_v44 = vpop.xlane.xlu1 %1424 }
 0x34a   :  { %2867 = vrcp.f32 %v1425_v44  ;;  %v1492_v38 = vsub.f32 2.0, %v1476_v53 }
 0x34b   :  { %2869 = vrcp.f32 %v1434_v42 }
 0x34c   :  { %v2864_v41 = vpop.eup %2863  ;;  %v1508_v60 = vmul.f32 %v2862_v35, %v1492_v38 }
 0x34d   :  { %v1475_v32 = vmul.f32 %v2864_v41, %v1419_v49  ;;  %v2866_v57 = vpop.eup %2865 }
 0x34e   :  { %v1478_v58 = vmul.f32 %v2866_v57, %v1428_v7 }
 0x34f   :  { %v1491_v45 = vsub.f32 2.0, %v1475_v32 }
 0x350   :  { %v1440_v11 = vpop.xlane.xlu0 %1439  ;;  %v1494_v5 = vsub.f32 2.0, %v1478_v58 }
 0x351   :  { %v1431_v15 = vpop.xlane.xlu1 %1430  ;;  %v1507_v6 = vmul.f32 %v2864_v41, %v1491_v45 }
 0x352   :  { %2871 = vrcp.f32 %v1431_v15  ;;  %v1510_v17 = vmul.f32 %v2866_v57, %v1494_v5 }
 0x353   :  { %2873 = vrcp.f32 %v1440_v11 }
 0x354   :  { %v2868_v25 = vpop.eup %2867 }
 0x355   :  { %v1477_v16 = vmul.f32 %v2868_v25, %v1425_v44  ;;  %v2870_v4 = vpop.eup %2869 }
 0x356   :  { %v1480_v10 = vmul.f32 %v2870_v4, %v1434_v42 }
 0x357   :  { %v1493_v22 = vsub.f32 2.0, %v1477_v16 }
 0x358   :  { %v1446_v9 = vpop.xlane.xlu0 %1445  ;;  %v1496_v26 = vsub.f32 2.0, %v1480_v10 }
 0x359   :  { %v1437_v59 = vpop.xlane.xlu1 %1436  ;;  %v1509_v12 = vmul.f32 %v2868_v25, %v1493_v22 }
 0x35a   :  { %2875 = vrcp.f32 %v1437_v59 }
 0x35b   :  { %2877 = vrcp.f32 %v1446_v9 }
 0x35c   :  { %v2872_v8 = vpop.eup %2871 }
 0x35d   :  { %v1479_v63 = vmul.f32 %v2872_v8, %v1431_v15 }
 0x360   :  { %v1452_v19 = vpop.xlane.xlu0 %1451 }
 0x361   :  { %v1443_v52 = vpop.xlane.xlu1 %1442 }
 0x362   :  { %2879 = vrcp.f32 %v1443_v52 }
 0x363   :  { %2881 = vrcp.f32 %v1452_v19 }
 0x36f   :  { %v1577_v24 = vpop.f32.mrb[56].mxu0 }
 0x370   :  { %v2273_v40 = vmul.f32 %v1577_v24, %v1504_v33  ;;  %v2679_v28 = vpop.f32.mrb[57].mxu0 }
 0x371   :  { %v1580_v29 = vpop.f32.mrb[58].mxu0 }
 0x372   :  { %2289 = vst [vmem:[#allocation7] sm:$0xff] %v2273_v40  ;;  %v2680_v27 = vpop.f32.mrb[59].mxu0  ;;  %v2874_v29 = vpop.eup %2873 }
 0x373   :  { %v1495_v27 = vsub.f32 2.0, %v1479_v63  ;;  %v1482_v44 = vmul.f32 %v2874_v29, %v1440_v11 }
 0x377   :  { %v1623_v30 = vpop.f32.mrb[56].mxu1 }
 0x378   :  { %v2274_v31 = vmul.f32 %v1623_v30, %v1505_v56  ;;  %v2685_v34 = vpop.f32.mrb[57].mxu1  ;;  %v2876_v56 = vpop.eup %2875 }
 0x379   :  { %v1626_v36 = vpop.f32.mrb[58].mxu1  ;;  %v1481_v30 = vmul.f32 %v2876_v56, %v1437_v59  ;;  %v1511_v34 = vmul.f32 %v2872_v8, %v1495_v27 }
 0x37a   :  { %2290 = vst [vmem:[#allocation7 + $0x8] sm:$0xff] %v2274_v31  ;;  %v2686_v39 = vpop.f32.mrb[59].mxu1  ;;  %v1449_v31 = vpop.xlane.xlu1 %1448  ;;  %v1512_v36 = vmul.f32 %v2870_v4, %v1496_v26 }
 0x37b   :  { %2883 = vrcp.f32 %v1449_v31 }
 0x37f   :  { %v1669_v43 = vpop.f32.mrb[60].mxu0 }
 0x380   :  { %v2275_v48 = vmul.f32 %v1669_v43, %v1506_v37  ;;  %v2691_v50 = vpop.f32.mrb[61].mxu0  ;;  %v2878_v37 = vpop.eup %2877  ;;  %v1498_v43 = vsub.f32 2.0, %v1482_v44 }
 0x381   :  { %v1672_v21 = vpop.f32.mrb[62].mxu0  ;;  %v2880_v57 = vpop.eup %2879  ;;  %v1484_v38 = vmul.f32 %v2878_v37, %v1446_v9 }
 0x382   :  { %2291 = vst [vmem:[#allocation7 + $0x10] sm:$0xff] %v2275_v48  ;;  %v2692_v54 = vpop.f32.mrb[63].mxu0  ;;  %v1497_v48 = vsub.f32 2.0, %v1481_v30  ;;  %v1483_v45 = vmul.f32 %v2880_v57, %v1443_v52  ;;  %v1514_v11 = vmul.f32 %v2874_v29, %v1498_v43 }
 0x383   :  { %v1455_v54 = vpop.xlane.xlu1 %1454 }
 0x384   :  { %v1513_v25 = vmul.f32 %v2876_v56, %v1497_v48  ;;  %2885 = vrcp.f32 %v1455_v54 }
 0x387   :  { %v1761_v2 = vpop.f32.mrb[64].mxu0 }
 0x388   :  { %v1715_v1 = vpop.f32.mrb[60].mxu1  ;;  %v2277_v51 = vmul.f32 %v1761_v2, %v1508_v60  ;;  %v2703_v62 = vpop.f32.mrb[65].mxu0 }
 0x389   :  { %v2276_v20 = vmul.f32 %v1715_v1, %v1507_v6  ;;  %v2697_v0 = vpop.f32.mrb[61].mxu1  ;;  %v1764_v14 = vpop.f32.mrb[66].mxu0  ;;  %v1499_v62 = vsub.f32 2.0, %v1483_v45 }
 0x38a   :  { %v1718_v3 = vpop.f32.mrb[62].mxu1  ;;  %2293 = vst [vmem:[#allocation7 + $0x20] sm:$0xff] %v2277_v51  ;;  %v2704_v61 = vpop.f32.mrb[67].mxu0  ;;  %v1500_v0 = vsub.f32 2.0, %v1484_v38 }
 0x38b   :  { %2292 = vst [vmem:[#allocation7 + $0x18] sm:$0xff] %v2276_v20  ;;  %v2698_v47 = vpop.f32.mrb[63].mxu1  ;;  %v2882_v51 = vpop.eup %2881 }
 0x38c   :  { %v2884_v4 = vpop.eup %2883  ;;  %v1486_v5 = vmul.f32 %v2882_v51, %v1452_v19  ;;  %v1515_v47 = vmul.f32 %v2880_v57, %v1499_v62  ;;  %v1516_v61 = vmul.f32 %v2878_v37, %v1500_v0 }
 0x38d   :  { %v1485_v22 = vmul.f32 %v2884_v4, %v1449_v31 }
 0x38f   :  { %v1853_v18 = vpop.f32.mrb[68].mxu0 }
 0x390   :  { %v1807_v55 = vpop.f32.mrb[64].mxu1  ;;  %v2279_v33 = vmul.f32 %v1853_v18, %v1510_v17  ;;  %v2715_v24 = vpop.f32.mrb[69].mxu0  ;;  %v1502_v18 = vsub.f32 2.0, %v1486_v5 }
 0x391   :  { %v2278_v23 = vmul.f32 %v1807_v55, %v1509_v12  ;;  %v2709_v49 = vpop.f32.mrb[65].mxu1  ;;  %v1856_v28 = vpop.f32.mrb[70].mxu0 }
 0x392   :  { %v1810_v40 = vpop.f32.mrb[66].mxu1  ;;  %2295 = vst [vmem:[#allocation7 + $0x30] sm:$0xff] %v2279_v33  ;;  %v2716_v7 = vpop.f32.mrb[71].mxu0  ;;  %v1518_v29 = vmul.f32 %v2882_v51, %v1502_v18 }
 0x393   :  { %2294 = vst [vmem:[#allocation7 + $0x28] sm:$0xff] %v2278_v23  ;;  %v2710_v46 = vpop.f32.mrb[67].mxu1  ;;  %v1501_v23 = vsub.f32 2.0, %v1485_v22  ;;  %v2886_v24 = vpop.eup %2885 }
 0x394   :  { %v1487_v40 = vmul.f32 %v2886_v24, %v1455_v54 }
 0x395   :  { %v1517_v28 = vmul.f32 %v2884_v4, %v1501_v23 }
 0x396   :  { %v1503_v31 = vsub.f32 2.0, %v1487_v40 }
 0x397   :  { %v1945_v35 = vpop.f32.mrb[72].mxu0 }
 0x398   :  { %v1899_v39 = vpop.f32.mrb[68].mxu1  ;;  %v2281_v41 = vmul.f32 %v1945_v35, %v1512_v36  ;;  %v2727_v53 = vpop.f32.mrb[73].mxu0 }
 0x399   :  { %v2280_v13 = vmul.f32 %v1899_v39, %v1511_v34  ;;  %v2721_v42 = vpop.f32.mrb[69].mxu1  ;;  %v1948_v15 = vpop.f32.mrb[74].mxu0  ;;  %v1519_v39 = vmul.f32 %v2886_v24, %v1503_v31 }
 0x39a   :  { %v1902_v32 = vpop.f32.mrb[70].mxu1  ;;  %2297 = vst [vmem:[#allocation7 + $0x40] sm:$0xff] %v2281_v41  ;;  %v2728_v21 = vpop.f32.mrb[75].mxu0 }
 0x39b   :  { %2296 = vst [vmem:[#allocation7 + $0x38] sm:$0xff] %v2280_v13  ;;  %v2722_v50 = vpop.f32.mrb[71].mxu1 }
 0x39f   :  { %v2037_v16 = vpop.f32.mrb[76].mxu0 }
 0x3a0   :  { %v1991_v58 = vpop.f32.mrb[72].mxu1  ;;  %v2283_v6 = vmul.f32 %v2037_v16, %v1514_v11  ;;  %v2739_v1 = vpop.f32.mrb[77].mxu0 }
 0x3a1   :  { %v2282_v59 = vmul.f32 %v1991_v58, %v1513_v25  ;;  %v2733_v60 = vpop.f32.mrb[73].mxu1  ;;  %v2040_v20 = vpop.f32.mrb[78].mxu0 }
 0x3a2   :  { %v1994_v2 = vpop.f32.mrb[74].mxu1  ;;  %2299 = vst [vmem:[#allocation7 + $0x50] sm:$0xff] %v2283_v6  ;;  %v2740_v14 = vpop.f32.mrb[79].mxu0 }
 0x3a3   :  { %2298 = vst [vmem:[#allocation7 + $0x48] sm:$0xff] %v2282_v59  ;;  %v2734_v3 = vpop.f32.mrb[75].mxu1 }
 0x3a7   :  { %v2129_v9 = vpop.f32.mrb[80].mxu0 }
 0x3a8   :  { %v2083_v8 = vpop.f32.mrb[76].mxu1  ;;  %v2285_v63 = vmul.f32 %v2129_v9, %v1516_v61  ;;  %v2751_v12 = vpop.f32.mrb[81].mxu0 }
 0x3a9   :  { %v2284_v10 = vmul.f32 %v2083_v8, %v1515_v47  ;;  %v2745_v52 = vpop.f32.mrb[77].mxu1  ;;  %v2132_v55 = vpop.f32.mrb[82].mxu0 }
 0x3aa   :  { %v2086_v17 = vpop.f32.mrb[78].mxu1  ;;  %2301 = vst [vmem:[#allocation7 + $0x60] sm:$0xff] %v2285_v63  ;;  %v2752_v49 = vpop.f32.mrb[83].mxu0 }
 0x3ab   :  { %2300 = vst [vmem:[#allocation7 + $0x58] sm:$0xff] %v2284_v10  ;;  %v2746_v33 = vpop.f32.mrb[79].mxu1 }
 0x3af   :  { %v2221_v27 = vpop.f32.mrb[84].mxu0 }
 0x3b0   :  { %v2175_v26 = vpop.f32.mrb[80].mxu1  ;;  %v2287_v7 = vmul.f32 %v2221_v27, %v1518_v29  ;;  %v2763_v19 = vpop.f32.mrb[85].mxu0 }
 0x3b1   :  { %v2286_v46 = vmul.f32 %v2175_v26, %v1517_v28  ;;  %v2757_v56 = vpop.f32.mrb[81].mxu1  ;;  %v2224_v30 = vpop.f32.mrb[86].mxu0 }
 0x3b2   :  { %v2178_v44 = vpop.f32.mrb[82].mxu1  ;;  %2303 = vst [vmem:[#allocation7 + $0x70] sm:$0xff] %v2287_v7  ;;  %v2764_v36 = vpop.f32.mrb[87].mxu0 }
 0x3b3   :  { %2302 = vst [vmem:[#allocation7 + $0x68] sm:$0xff] %v2286_v46  ;;  %v2758_v34 = vpop.f32.mrb[83].mxu1 }
 0x3b8   :  { %v2267_v35 = vpop.f32.mrb[84].mxu1 }
 0x3b9   :  { %v2288_v13 = vmul.f32 %v2267_v35, %v1519_v39  ;;  %v2769_v41 = vpop.f32.mrb[85].mxu1 }
 0x3ba   :  { %v2270_v42 = vpop.f32.mrb[86].mxu1 }
 0x3bb   :  { %2304 = vst [vmem:[#allocation7 + $0x78] sm:$0xff] %v2288_v13  ;;  %v2770_v53 = vpop.f32.mrb[87].mxu1 }
 0x3bc   :  { %2942 = shalt.err (!%p2939_p6)
}
 0x3bd   :  { %s2943_s17 = scalar_lea.hbm %s3381_s3, 2048 }
 0x3be   :  { %p2944_p7 = scmp.ne.s32.totalorder %s3381_s3, %s2943_s17  ;;  %p2947_p8 = scmp.lt.u32.totalorder %s2943_s17, %s3381_s3 }
 0x3c0   :  { %p2949_p9 = pnand %p2947_p8, %p2944_p7 }
 0x3c2   :  { %2952 = shalt.err (!%p2949_p9)
}
 0x3c3   :  { %s2969_s22 = smov 128   ;;  %s2970_s23 = smov 8  }
 0x3c4   :  { %2316 = dma.vmem_to_hbm [thread:$0]  %s2311_s13, 2048, %s3381_s3, [#allocation4], %s2969_s22, %s2969_s22, %s2970_s23  }
 0x3c5   :  { %2957 = dma.done.wait [#allocation4], 2048  }
 0x3c6   :  { %2958 = vsyncadd [#allocation4], 4294965248 }
 0x3c7   :  { %2320 = vsyncpa [#allocation3], 1 }
 0x3c8   :  { %2321 = vsyncpa [#allocation6], 1 }
 0x3c9   :  { %2322 = vsyncpa [#allocation4], 1 }

</bundles_post_ra>
